<compile_context>
chip_gen: v6e
topology: v6e:2x2x1
jax: 0.10.0
libtpu: 0.0.40
codegen_flags: <defaults>
</compile_context>

<pallas_src>
import functools
import math

import jax
import jax.numpy as jnp
from jax import lax
from jax.experimental import pallas as pl
from jax.experimental.pallas import tpu as pltpu


# ------------------------------ fused forward kernel ------------------------------

def _fused_forward_kernel(
    # per-batch-tile activations / data
    emb_ref, mask_ref, feat_ref, label_ref, wgt_ref,
    # embedding LayerNorm
    emb_ln_g_ref, emb_ln_b_ref,
    # per-layer params (leading layer axis blocked by the grid, squeezed here)
    wqkv_ref, bqkv_ref, wo_ref, bo_ref, ln1_g_ref, ln1_b_ref,
    wi_ref, bi_ref, wf_ref, bf_ref, ln2_g_ref, ln2_b_ref,
    # pooler + classifier
    pool_w_ref, pool_b_ref, w1p_ref, w1f_ref, b1_ref, w2_ref, b2_ref,
    # outputs
    logits_ref, per_loss_ref,
    # VMEM scratch
    x_scr, ctx_scr,
    *, tb, S, H, nH, dH, scale):

  l = pl.program_id(1)
  n_layers = pl.num_programs(1)
  f32 = jnp.float32
  bf16 = jnp.bfloat16

  def layernorm(x, g, b):
    mu = jnp.mean(x, axis=-1, keepdims=True)
    var = jnp.mean(jnp.square(x - mu), axis=-1, keepdims=True)
    return (x - mu) * lax.rsqrt(var + 1e-12) * g + b

  def gelu(x):
    # TODO(synk): tanh-approximate GELU (HF BERT default is the exact erf form).
    return 0.5 * x * (1.0 + jnp.tanh(0.7978845608028654 * (x + 0.044715 * x * x * x)))

  # --- init: embedding LayerNorm into the VMEM-resident residual stream ---
  @pl.when(l == 0)
  def _():
    x0 = emb_ref[...].reshape(tb * S, H)
    x_scr[...] = layernorm(x0, emb_ln_g_ref[...], emb_ln_b_ref[...])

  x = x_scr[...]                                                     # (tb*S, H) f32

  # additive attention-mask bias, materialized ONCE per layer (not per head)
  bias = jnp.broadcast_to((1.0 - mask_ref[...]) * -1e9, (tb, S, S))  # f32

  # --- self attention: fused QKV projection (bf16 operands, f32 accumulation) ---
  qkv = jnp.dot(x.astype(bf16), wqkv_ref[...],
                preferred_element_type=f32) + bqkv_ref[...]          # (tb*S, 3H)
  q = qkv[:, :H].reshape(tb, S, H).astype(bf16)
  k = qkv[:, H:2 * H].reshape(tb, S, H).astype(bf16)
  v = qkv[:, 2 * H:].reshape(tb, S, H).astype(bf16)

  for h in range(nH):                          # static head loop; L is on the grid
    sl = slice(h * dH, (h + 1) * dH)
    s = jnp.einsum("bqd,bkd->bqk", q[:, :, sl], k[:, :, sl],
                   preferred_element_type=f32) * scale + bias        # (tb,S,S) f32
    m = jnp.max(s, axis=-1, keepdims=True)
    p = jnp.exp(s - m)
    p = p * pl.reciprocal(jnp.sum(p, axis=-1, keepdims=True), approx=True)
    ctx_h = jnp.einsum("bqk,bkd->bqd", p.astype(bf16), v[:, :, sl],
                       preferred_element_type=f32)                   # (tb,S,dH)
    ctx_scr[:, sl] = ctx_h.reshape(tb * S, dH)                       # head merge

  # single full-width output projection (K = H) instead of nH rank-dH matmuls
  attn = jnp.dot(ctx_scr[...].astype(bf16), wo_ref[...],
                 preferred_element_type=f32) + bo_ref[...]
  x = layernorm(attn + x, ln1_g_ref[...], ln1_b_ref[...])

  # --- feed-forward ---
  inter = gelu(jnp.dot(x.astype(bf16), wi_ref[...],
                       preferred_element_type=f32) + bi_ref[...])
  ffn = jnp.dot(inter.astype(bf16), wf_ref[...],
                preferred_element_type=f32) + bf_ref[...]
  x = layernorm(ffn + x, ln2_g_ref[...], ln2_b_ref[...])
  x_scr[...] = x

  # --- finalize on the last layer: pooler + classifier + weighted BCE ---
  @pl.when(l == n_layers - 1)
  def _():
    cls_tok = x.reshape(tb, S, H)[:, 0, :]                           # (tb, H)
    pooled = jnp.tanh(
        jnp.dot(cls_tok.astype(bf16), pool_w_ref[...], preferred_element_type=f32)
        + pool_b_ref[...])
    feats = feat_ref[...][:, 0, :]                                   # (tb, F)
    # classifier's feature concat folded into a split matmul
    h1 = (jnp.dot(pooled.astype(bf16), w1p_ref[...], preferred_element_type=f32)
          + jnp.dot(feats.astype(bf16), w1f_ref[...], preferred_element_type=f32)
          + b1_ref[...])
    h1 = jnp.maximum(h1, 0.0)
    logits = jnp.dot(h1.astype(bf16), w2_ref[...],
                     preferred_element_type=f32) + b2_ref[...]        # (tb, 1)
    logits_ref[...] = logits.reshape(tb, 1, 1)

    y = label_ref[...].reshape(tb, 1)
    w = wgt_ref[...].reshape(tb, 1)
    per = (jnp.maximum(logits, 0.0) - logits * y
           + jnp.log(1.0 + jnp.exp(-jnp.abs(logits))))
    per_loss_ref[...] = (w * per).reshape(tb, 1, 1)


# ------------------------------ model definition ------------------------------

def init_params(key, cfg):
  H, I, L = cfg["hidden"], cfg["intermediate"], cfg["layers"]
  F, HU = cfg["feature_dim"], cfg["hidden_units"]
  bf16 = jnp.bfloat16

  def norm(k, shape, std=0.02):
    return std * jax.random.normal(k, shape, jnp.float32)

  keys = iter(jax.random.split(key, 16))
  params = {
      "word_emb": norm(next(keys), (cfg["vocab"], H)),
      "pos_emb": norm(next(keys), (cfg["max_pos"], H)),
      "type_emb": norm(next(keys), (cfg["type_vocab"], H)),
      "emb_ln_g": jnp.ones((1, H), jnp.float32),
      "emb_ln_b": jnp.zeros((1, H), jnp.float32),
      # per-layer params stacked on a leading layer axis; matmul weights in bf16
      "wqkv": norm(next(keys), (L, H, 3 * H)).astype(bf16),
      "bqkv": jnp.zeros((L, 1, 3 * H), jnp.float32),
      "wo": norm(next(keys), (L, H, H)).astype(bf16),
      "bo": jnp.zeros((L, 1, H), jnp.float32),
      "ln1_g": jnp.ones((L, 1, H), jnp.float32),
      "ln1_b": jnp.zeros((L, 1, H), jnp.float32),
      "wi": norm(next(keys), (L, H, I)).astype(bf16),
      "bi": jnp.zeros((L, 1, I), jnp.float32),
      "wf": norm(next(keys), (L, I, H)).astype(bf16),
      "bf": jnp.zeros((L, 1, H), jnp.float32),
      "ln2_g": jnp.ones((L, 1, H), jnp.float32),
      "ln2_b": jnp.zeros((L, 1, H), jnp.float32),
      "pool_w": norm(next(keys), (H, H)).astype(bf16),
      "pool_b": jnp.zeros((1, H), jnp.float32),
      # classifier first linear split into [pooled | features] row blocks
      "cls_w1_pool": norm(next(keys), (H, HU)).astype(bf16),
      "cls_w1_feat": norm(next(keys), (F, HU)).astype(bf16),
      "cls_b1": jnp.zeros((1, HU), jnp.float32),
      "cls_w2": norm(next(keys), (HU, 1)).astype(bf16),
      "cls_b2": jnp.zeros((1, 1), jnp.float32),
  }
  return params


def forward(params, input_ids, token_type_ids, attention_mask, features, weight,
            is_duplicate, *, cfg):
  B, S = input_ids.shape
  H = cfg["hidden"]
  nH = cfg["heads"]
  dH = H // nH
  L = cfg["layers"]
  I = cfg["intermediate"]
  F = cfg["feature_dim"]
  HU = cfg["hidden_units"]

  # --- embeddings: data-dependent gathers stay in XLA; everything after is fused ---
  pos_ids = jnp.arange(S)[None, :]
  emb = (params["word_emb"][input_ids]
         + params["pos_emb"][pos_ids]
         + params["type_emb"][token_type_ids]).astype(jnp.float32)      # (B, S, H)

  # batch kept on a leading (non-tiled-layout) axis so any batch tile size is legal
  mask3 = attention_mask.astype(jnp.float32).reshape(B, 1, S)
  feat3 = features.astype(jnp.float32).reshape(B, 1, F)
  label3 = is_duplicate.astype(jnp.float32).reshape(B, 1, 1)
  wgt3 = weight.astype(jnp.float32).reshape(B, 1, 1)

  # parallel batch axis: each of v7x's two TensorCores takes half the batch
  tb = B // 2 if (B % 2 == 0 and B >= 2) else B
  nb = B // tb

  kernel = functools.partial(
      _fused_forward_kernel,
      tb=tb, S=S, H=H, nH=nH, dH=dH, scale=1.0 / math.sqrt(dH))

  # per-step VMEM working set: double-buffered bf16 per-layer weights + f32 activations
  per_layer_w = 2 * (H * 3 * H + H * H + H * I + I * H)          # bf16 bytes
  act = 4 * (tb * S) * (3 * H + 5 * H + I) + 4 * tb * 4 * S * S  # f32 bytes (rough)
  const = 2 * (H * H + H * HU + F * HU + HU) + 4 * (tb * S * H)
  vmem_limit = int(min(100 * 2**20,
                       max(16 * 2**20, 4 * (2 * per_layer_w + act + const))))

  def batch_spec(d1, d2):
    return pl.BlockSpec((tb, d1, d2), lambda b, l: (b, 0, 0))

  def layer_spec(d1, d2):
    return pl.BlockSpec((None, d1, d2), lambda b, l: (l, 0, 0))

  def const_spec(shape):
    nd = len(shape)
    return pl.BlockSpec(shape, lambda b, l: (0,) * nd)

  in_specs = [
      batch_spec(S, H),        # emb
      batch_spec(1, S),        # mask
      batch_spec(1, F),        # features
      batch_spec(1, 1),        # labels
      batch_spec(1, 1),        # weights
      const_spec((1, H)),      # emb_ln_g
      const_spec((1, H)),      # emb_ln_b
      layer_spec(H, 3 * H),    # wqkv
      layer_spec(1, 3 * H),    # bqkv
      layer_spec(H, H),        # wo
      layer_spec(1, H),        # bo
      layer_spec(1, H),        # ln1_g
      layer_spec(1, H),        # ln1_b
      layer_spec(H, I),        # wi
      layer_spec(1, I),        # bi
      layer_spec(I, H),        # wf
      layer_spec(1, H),        # bf
      layer_spec(1, H),        # ln2_g
      layer_spec(1, H),        # ln2_b
      const_spec((H, H)),      # pool_w
      const_spec((1, H)),      # pool_b
      const_spec((H, HU)),     # cls_w1_pool
      const_spec((F, HU)),     # cls_w1_feat
      const_spec((1, HU)),     # cls_b1
      const_spec((HU, 1)),     # cls_w2
      const_spec((1, 1)),      # cls_b2
  ]

  logits3, per_loss3 = pl.pallas_call(
      kernel,
      out_shape=(jax.ShapeDtypeStruct((B, 1, 1), jnp.float32),
                 jax.ShapeDtypeStruct((B, 1, 1), jnp.float32)),
      grid=(nb, L),
      in_specs=in_specs,
      out_specs=(batch_spec(1, 1), batch_spec(1, 1)),
      scratch_shapes=[pltpu.VMEM((tb * S, H), jnp.float32),   # residual stream
                      pltpu.VMEM((tb * S, H), jnp.float32)],  # merged attention ctx
      compiler_params=pltpu.CompilerParams(
          dimension_semantics=("parallel", "arbitrary"),
          vmem_limit_bytes=vmem_limit),
  )(emb, mask3, feat3, label3, wgt3,
    params["emb_ln_g"], params["emb_ln_b"],
    params["wqkv"], params["bqkv"], params["wo"], params["bo"],
    params["ln1_g"], params["ln1_b"],
    params["wi"], params["bi"], params["wf"], params["bf"],
    params["ln2_g"], params["ln2_b"],
    params["pool_w"], params["pool_b"],
    params["cls_w1_pool"], params["cls_w1_feat"], params["cls_b1"],
    params["cls_w2"], params["cls_b2"])

  logits = logits3.reshape(B, 1)
  loss = jnp.sum(per_loss3) / B            # mean weighted BCE over the batch
  return loss, logits


# ------------------------------ main ------------------------------

if __name__ == "__main__":
  cfg = dict(vocab=100, hidden=32, heads=2, layers=2, intermediate=64,
             max_pos=16, type_vocab=2, feature_dim=4, hidden_units=32)
  B, S = 2, 8

  key = jax.random.PRNGKey(0)
  k_ids, k_feat, k_w, k_dup, k_params = jax.random.split(key, 5)

  input_ids = jax.random.randint(k_ids, (B, S), 0, cfg["vocab"], dtype=jnp.int32)
  token_type_ids = jnp.zeros((B, S), jnp.int32).at[:, S // 2:].set(1)
  attention_mask = jnp.ones((B, S), jnp.int32).at[1, S - 2:].set(0)
  features = jax.random.normal(k_feat, (B, cfg["feature_dim"]), jnp.float32)
  weight = jax.random.uniform(k_w, (B,), jnp.float32, 0.5, 1.5)
  is_duplicate = jax.random.randint(k_dup, (B,), 0, 2, dtype=jnp.int32)

  params = init_params(k_params, cfg)

  fwd = jax.jit(functools.partial(forward, cfg=cfg))
  loss, logits = fwd(params, input_ids, token_type_ids, attention_mask,
                     features, weight, is_duplicate)
  jax.block_until_ready((loss, logits))
  assert logits.shape == (B, 1) and loss.shape == ()
  assert bool(jnp.isfinite(loss)) and bool(jnp.all(jnp.isfinite(logits)))
  print("KERNEL_OK")
</pallas_src>

<mosaic_0001>
module attributes {stable_mosaic.version = 11 : i64} {
  func.func @_fused_forward_kernel(%arg0: i32, %arg1: i32, %arg2: memref<1x8x32xf32, #tpu.memory_space<vmem>>, %arg3: memref<1x1x8xf32, #tpu.memory_space<vmem>>, %arg4: memref<1x1x4xf32, #tpu.memory_space<vmem>>, %arg5: memref<1x1x1xf32, #tpu.memory_space<vmem>>, %arg6: memref<1x1x1xf32, #tpu.memory_space<vmem>>, %arg7: memref<1x32xf32, #tpu.memory_space<vmem>>, %arg8: memref<1x32xf32, #tpu.memory_space<vmem>>, %arg9: memref<1x32x96xbf16, #tpu.memory_space<vmem>>, %arg10: memref<1x1x96xf32, #tpu.memory_space<vmem>>, %arg11: memref<1x32x32xbf16, #tpu.memory_space<vmem>>, %arg12: memref<1x1x32xf32, #tpu.memory_space<vmem>>, %arg13: memref<1x1x32xf32, #tpu.memory_space<vmem>>, %arg14: memref<1x1x32xf32, #tpu.memory_space<vmem>>, %arg15: memref<1x32x64xbf16, #tpu.memory_space<vmem>>, %arg16: memref<1x1x64xf32, #tpu.memory_space<vmem>>, %arg17: memref<1x64x32xbf16, #tpu.memory_space<vmem>>, %arg18: memref<1x1x32xf32, #tpu.memory_space<vmem>>, %arg19: memref<1x1x32xf32, #tpu.memory_space<vmem>>, %arg20: memref<1x1x32xf32, #tpu.memory_space<vmem>>, %arg21: memref<32x32xbf16, #tpu.memory_space<vmem>>, %arg22: memref<1x32xf32, #tpu.memory_space<vmem>>, %arg23: memref<32x32xbf16, #tpu.memory_space<vmem>>, %arg24: memref<4x32xbf16, #tpu.memory_space<vmem>>, %arg25: memref<1x32xf32, #tpu.memory_space<vmem>>, %arg26: memref<32x1xbf16, #tpu.memory_space<vmem>>, %arg27: memref<1x1xf32, #tpu.memory_space<vmem>>, %arg28: memref<1x1x1xf32, #tpu.memory_space<vmem>>, %arg29: memref<1x1x1xf32, #tpu.memory_space<vmem>>, %arg30: memref<8x32xf32, #tpu.memory_space<vmem>>, %arg31: memref<8x32xf32, #tpu.memory_space<vmem>>) attributes {dimension_semantics = [#tpu.dimension_semantics<parallel>, #tpu.dimension_semantics<arbitrary>], iteration_bounds = array<i64: 2, 2>, scalar_prefetch = 0 : i64, scratch_operands = 2 : i64, tpu.core_type = #tpu.core_type<tc>, window_params = [{transform_indices = @transform_0, window_bounds = array<i64: 1, 8, 32>}, {transform_indices = @transform_1, window_bounds = array<i64: 1, 1, 8>}, {transform_indices = @transform_2, window_bounds = array<i64: 1, 1, 4>}, {transform_indices = @transform_3, window_bounds = array<i64: 1, 1, 1>}, {transform_indices = @transform_4, window_bounds = array<i64: 1, 1, 1>}, {pipeline_mode = #tpu.pipeline_mode<synchronous>, transform_indices = @transform_5, window_bounds = array<i64: 1, 32>}, {pipeline_mode = #tpu.pipeline_mode<synchronous>, transform_indices = @transform_6, window_bounds = array<i64: 1, 32>}, {transform_indices = @transform_7, window_bounds = array<i64: 1, 32, 96>}, {transform_indices = @transform_8, window_bounds = array<i64: 1, 1, 96>}, {transform_indices = @transform_9, window_bounds = array<i64: 1, 32, 32>}, {transform_indices = @transform_10, window_bounds = array<i64: 1, 1, 32>}, {transform_indices = @transform_11, window_bounds = array<i64: 1, 1, 32>}, {transform_indices = @transform_12, window_bounds = array<i64: 1, 1, 32>}, {transform_indices = @transform_13, window_bounds = array<i64: 1, 32, 64>}, {transform_indices = @transform_14, window_bounds = array<i64: 1, 1, 64>}, {transform_indices = @transform_15, window_bounds = array<i64: 1, 64, 32>}, {transform_indices = @transform_16, window_bounds = array<i64: 1, 1, 32>}, {transform_indices = @transform_17, window_bounds = array<i64: 1, 1, 32>}, {transform_indices = @transform_18, window_bounds = array<i64: 1, 1, 32>}, {pipeline_mode = #tpu.pipeline_mode<synchronous>, transform_indices = @transform_19, window_bounds = array<i64: 32, 32>}, {pipeline_mode = #tpu.pipeline_mode<synchronous>, transform_indices = @transform_20, window_bounds = array<i64: 1, 32>}, {pipeline_mode = #tpu.pipeline_mode<synchronous>, transform_indices = @transform_21, window_bounds = array<i64: 32, 32>}, {pipeline_mode = #tpu.pipeline_mode<synchronous>, transform_indices = @transform_22, window_bounds = array<i64: 4, 32>}, {pipeline_mode = #tpu.pipeline_mode<synchronous>, transform_indices = @transform_23, window_bounds = array<i64: 1, 32>}, {pipeline_mode = #tpu.pipeline_mode<synchronous>, transform_indices = @transform_24, window_bounds = array<i64: 32, 1>}, {pipeline_mode = #tpu.pipeline_mode<synchronous>, transform_indices = @transform_25, window_bounds = array<i64: 1, 1>}, {transform_indices = @transform_26, window_bounds = array<i64: 1, 1, 1>}, {transform_indices = @transform_27, window_bounds = array<i64: 1, 1, 1>}]} {
    %c0_i32 = arith.constant 0 : i32
    %0 = arith.cmpi eq, %arg1, %c0_i32 : i32
    %1 = arith.extui %0 : i1 to i32
    %c0_i32_0 = arith.constant 0 : i32
    %2 = arith.cmpi ne, %1, %c0_i32_0 : i32
    scf.if %2 {
      %c0_78 = arith.constant 0 : index
      %c0_79 = arith.constant 0 : index
      %c0_80 = arith.constant 0 : index
      %166 = vector.load %arg2[%c0_78, %c0_79, %c0_80] : memref<1x8x32xf32, #tpu.memory_space<vmem>>, vector<1x8x32xf32>
      %167 = vector.shape_cast %166 : vector<1x8x32xf32> to vector<8x32xf32>
      %c0_81 = arith.constant 0 : index
      %c0_82 = arith.constant 0 : index
      %168 = vector.load %arg7[%c0_81, %c0_82] : memref<1x32xf32, #tpu.memory_space<vmem>>, vector<1x32xf32>
      %c0_83 = arith.constant 0 : index
      %c0_84 = arith.constant 0 : index
      %169 = vector.load %arg8[%c0_83, %c0_84] : memref<1x32xf32, #tpu.memory_space<vmem>>, vector<1x32xf32>
      %cst_85 = arith.constant dense<0.000000e+00> : vector<8xf32>
      %170 = vector.multi_reduction <add>, %167, %cst_85 [1] : vector<8x32xf32> to vector<8xf32>
      %171 = vector.shape_cast %170 : vector<8xf32> to vector<8x1xf32>
      %cst_86 = arith.constant 3.200000e+01 : f32
      %172 = vector.broadcast %cst_86 : f32 to vector<8x1xf32>
      %173 = arith.divf %171, %172 : vector<8x1xf32>
      %174 = vector.broadcast %173 : vector<8x1xf32> to vector<8x32xf32>
      %175 = arith.subf %167, %174 : vector<8x32xf32>
      %176 = arith.mulf %175, %175 : vector<8x32xf32>
      %cst_87 = arith.constant dense<0.000000e+00> : vector<8xf32>
      %177 = vector.multi_reduction <add>, %176, %cst_87 [1] : vector<8x32xf32> to vector<8xf32>
      %178 = vector.shape_cast %177 : vector<8xf32> to vector<8x1xf32>
      %cst_88 = arith.constant 3.200000e+01 : f32
      %179 = vector.broadcast %cst_88 : f32 to vector<8x1xf32>
      %180 = arith.divf %178, %179 : vector<8x1xf32>
      %181 = vector.broadcast %173 : vector<8x1xf32> to vector<8x32xf32>
      %182 = arith.subf %167, %181 : vector<8x32xf32>
      %cst_89 = arith.constant 9.99999996E-13 : f32
      %183 = vector.broadcast %cst_89 : f32 to vector<8x1xf32>
      %184 = arith.addf %180, %183 : vector<8x1xf32>
      %185 = math.rsqrt %184 : vector<8x1xf32>
      %186 = vector.broadcast %185 : vector<8x1xf32> to vector<8x32xf32>
      %187 = arith.mulf %182, %186 : vector<8x32xf32>
      %188 = vector.broadcast %168 : vector<1x32xf32> to vector<8x32xf32>
      %189 = arith.mulf %187, %188 : vector<8x32xf32>
      %190 = vector.broadcast %169 : vector<1x32xf32> to vector<8x32xf32>
      %191 = arith.addf %189, %190 : vector<8x32xf32>
      %c0_90 = arith.constant 0 : index
      %c0_91 = arith.constant 0 : index
      %192 = vector.load %arg30[%c0_90, %c0_91] : memref<8x32xf32, #tpu.memory_space<vmem>>, vector<8x32xf32>
      tpu.vector_store %arg30[%c0_90, %c0_91], %191 {strides = array<i32>} : memref<8x32xf32, #tpu.memory_space<vmem>>, vector<8x32xf32>,
    } else {
    }
    %c0 = arith.constant 0 : index
    %c0_1 = arith.constant 0 : index
    %3 = vector.load %arg30[%c0, %c0_1] : memref<8x32xf32, #tpu.memory_space<vmem>>, vector<8x32xf32>
    %c0_2 = arith.constant 0 : index
    %c0_3 = arith.constant 0 : index
    %c0_4 = arith.constant 0 : index
    %4 = vector.load %arg3[%c0_2, %c0_3, %c0_4] : memref<1x1x8xf32, #tpu.memory_space<vmem>>, vector<1x1x8xf32>
    %cst = arith.constant 1.000000e+00 : f32
    %5 = vector.broadcast %cst : f32 to vector<1x1x8xf32>
    %6 = arith.subf %5, %4 : vector<1x1x8xf32>
    %cst_5 = arith.constant -1.000000e+09 : f32
    %7 = vector.broadcast %cst_5 : f32 to vector<1x1x8xf32>
    %8 = arith.mulf %6, %7 : vector<1x1x8xf32>
    %9 = vector.shape_cast %8 : vector<1x1x8xf32> to vector<1x1x8xf32>
    %10 = vector.broadcast %9 : vector<1x1x8xf32> to vector<1x8x8xf32>
    %11 = arith.truncf %3 : vector<8x32xf32> to vector<8x32xbf16>
    %c0_6 = arith.constant 0 : index
    %c0_7 = arith.constant 0 : index
    %c0_8 = arith.constant 0 : index
    %12 = vector.load %arg9[%c0_6, %c0_7, %c0_8] : memref<1x32x96xbf16, #tpu.memory_space<vmem>>, vector<1x32x96xbf16>
    %13 = vector.shape_cast %12 : vector<1x32x96xbf16> to vector<32x96xbf16>
    %cst_9 = arith.constant dense<0.000000e+00> : vector<8x96xf32>
    %14 = tpu.matmul %11, %13, %cst_9 {dimension_numbers = #tpu.dot_dimension_numbers<[1], [0], [0], [1], [0, 0, 1, 1], [], []>} : vector<8x32xbf16>, vector<32x96xbf16>, vector<8x96xf32> -> vector<8x96xf32>
    %c0_10 = arith.constant 0 : index
    %c0_11 = arith.constant 0 : index
    %c0_12 = arith.constant 0 : index
    %15 = vector.load %arg10[%c0_10, %c0_11, %c0_12] : memref<1x1x96xf32, #tpu.memory_space<vmem>>, vector<1x1x96xf32>
    %16 = vector.shape_cast %15 : vector<1x1x96xf32> to vector<1x96xf32>
    %17 = vector.broadcast %16 : vector<1x96xf32> to vector<8x96xf32>
    %18 = arith.addf %14, %17 : vector<8x96xf32>
    %19 = vector.extract_strided_slice %18 {offsets = [0, 0], sizes = [8, 32], strides = [1, 1]} : vector<8x96xf32> to vector<8x32xf32>
    %20 = vector.shape_cast %19 : vector<8x32xf32> to vector<1x8x32xf32>
    %21 = arith.truncf %20 : vector<1x8x32xf32> to vector<1x8x32xbf16>
    %22 = vector.extract_strided_slice %18 {offsets = [0, 32], sizes = [8, 32], strides = [1, 1]} : vector<8x96xf32> to vector<8x32xf32>
    %23 = vector.shape_cast %22 : vector<8x32xf32> to vector<1x8x32xf32>
    %24 = arith.truncf %23 : vector<1x8x32xf32> to vector<1x8x32xbf16>
    %25 = vector.extract_strided_slice %18 {offsets = [0, 64], sizes = [8, 32], strides = [1, 1]} : vector<8x96xf32> to vector<8x32xf32>
    %26 = vector.shape_cast %25 : vector<8x32xf32> to vector<1x8x32xf32>
    %27 = arith.truncf %26 : vector<1x8x32xf32> to vector<1x8x32xbf16>
    %28 = vector.extract_strided_slice %21 {offsets = [0, 0, 0], sizes = [1, 8, 16], strides = [1, 1, 1]} : vector<1x8x32xbf16> to vector<1x8x16xbf16>
    %29 = vector.extract_strided_slice %24 {offsets = [0, 0, 0], sizes = [1, 8, 16], strides = [1, 1, 1]} : vector<1x8x32xbf16> to vector<1x8x16xbf16>
    "tpu.trace_start"() <{level = 10 : i32, message = "bqd,bkd->bqk"}> : () -> ()
    %cst_13 = arith.constant dense<0.000000e+00> : vector<1x8x8xf32>
    %30 = tpu.matmul %28, %29, %cst_13 {dimension_numbers = #tpu.dot_dimension_numbers<[2], [2], [1], [1], [0, 0, 0, 1, 1, 1], [0], [0]>} : vector<1x8x16xbf16>, vector<1x8x16xbf16>, vector<1x8x8xf32> -> vector<1x8x8xf32>
    "tpu.trace_stop"() : () -> ()
    %cst_14 = arith.constant 2.500000e-01 : f32
    %31 = vector.broadcast %cst_14 : f32 to vector<1x8x8xf32>
    %32 = arith.mulf %30, %31 : vector<1x8x8xf32>
    %33 = arith.addf %32, %10 : vector<1x8x8xf32>
    %cst_15 = arith.constant dense<0xFF800000> : vector<1x8xf32>
    %34 = vector.multi_reduction <maximumf>, %33, %cst_15 [2] : vector<1x8x8xf32> to vector<1x8xf32>
    %35 = vector.shape_cast %34 : vector<1x8xf32> to vector<1x8x1xf32>
    %36 = vector.broadcast %35 : vector<1x8x1xf32> to vector<1x8x8xf32>
    %37 = arith.subf %33, %36 : vector<1x8x8xf32>
    %38 = math.exp %37 : vector<1x8x8xf32>
    %cst_16 = arith.constant dense<0.000000e+00> : vector<1x8xf32>
    %39 = vector.multi_reduction <add>, %38, %cst_16 [2] : vector<1x8x8xf32> to vector<1x8xf32>
    %40 = vector.shape_cast %39 : vector<1x8xf32> to vector<1x8x1xf32>
    %41 = tpu.reciprocal %40 {approx = true} : vector<1x8x1xf32> -> vector<1x8x1xf32>
    %42 = vector.broadcast %41 : vector<1x8x1xf32> to vector<1x8x8xf32>
    %43 = arith.mulf %38, %42 : vector<1x8x8xf32>
    %44 = arith.truncf %43 : vector<1x8x8xf32> to vector<1x8x8xbf16>
    %45 = vector.extract_strided_slice %27 {offsets = [0, 0, 0], sizes = [1, 8, 16], strides = [1, 1, 1]} : vector<1x8x32xbf16> to vector<1x8x16xbf16>
    "tpu.trace_start"() <{level = 10 : i32, message = "bqk,bkd->bqd"}> : () -> ()
    %cst_17 = arith.constant dense<0.000000e+00> : vector<1x8x16xf32>
    %46 = tpu.matmul %44, %45, %cst_17 {dimension_numbers = #tpu.dot_dimension_numbers<[2], [1], [1], [2], [0, 0, 0, 1, 1, 2], [0], [0]>} : vector<1x8x8xbf16>, vector<1x8x16xbf16>, vector<1x8x16xf32> -> vector<1x8x16xf32>
    "tpu.trace_stop"() : () -> ()
    %47 = vector.shape_cast %46 : vector<1x8x16xf32> to vector<8x16xf32>
    %c0_18 = arith.constant 0 : index
    %c0_19 = arith.constant 0 : index
    %48 = vector.load %arg31[%c0_18, %c0_19] : memref<8x32xf32, #tpu.memory_space<vmem>>, vector<8x16xf32>
    tpu.vector_store %arg31[%c0_18, %c0_19], %47 {strides = array<i32>} : memref<8x32xf32, #tpu.memory_space<vmem>>, vector<8x16xf32>,
    %49 = vector.extract_strided_slice %21 {offsets = [0, 0, 16], sizes = [1, 8, 16], strides = [1, 1, 1]} : vector<1x8x32xbf16> to vector<1x8x16xbf16>
    %50 = vector.extract_strided_slice %24 {offsets = [0, 0, 16], sizes = [1, 8, 16], strides = [1, 1, 1]} : vector<1x8x32xbf16> to vector<1x8x16xbf16>
    "tpu.trace_start"() <{level = 10 : i32, message = "bqd,bkd->bqk"}> : () -> ()
    %cst_20 = arith.constant dense<0.000000e+00> : vector<1x8x8xf32>
    %51 = tpu.matmul %49, %50, %cst_20 {dimension_numbers = #tpu.dot_dimension_numbers<[2], [2], [1], [1], [0, 0, 0, 1, 1, 1], [0], [0]>} : vector<1x8x16xbf16>, vector<1x8x16xbf16>, vector<1x8x8xf32> -> vector<1x8x8xf32>
    "tpu.trace_stop"() : () -> ()
    %cst_21 = arith.constant 2.500000e-01 : f32
    %52 = vector.broadcast %cst_21 : f32 to vector<1x8x8xf32>
    %53 = arith.mulf %51, %52 : vector<1x8x8xf32>
    %54 = arith.addf %53, %10 : vector<1x8x8xf32>
    %cst_22 = arith.constant dense<0xFF800000> : vector<1x8xf32>
    %55 = vector.multi_reduction <maximumf>, %54, %cst_22 [2] : vector<1x8x8xf32> to vector<1x8xf32>
    %56 = vector.shape_cast %55 : vector<1x8xf32> to vector<1x8x1xf32>
    %57 = vector.broadcast %56 : vector<1x8x1xf32> to vector<1x8x8xf32>
    %58 = arith.subf %54, %57 : vector<1x8x8xf32>
    %59 = math.exp %58 : vector<1x8x8xf32>
    %cst_23 = arith.constant dense<0.000000e+00> : vector<1x8xf32>
    %60 = vector.multi_reduction <add>, %59, %cst_23 [2] : vector<1x8x8xf32> to vector<1x8xf32>
    %61 = vector.shape_cast %60 : vector<1x8xf32> to vector<1x8x1xf32>
    %62 = tpu.reciprocal %61 {approx = true} : vector<1x8x1xf32> -> vector<1x8x1xf32>
    %63 = vector.broadcast %62 : vector<1x8x1xf32> to vector<1x8x8xf32>
    %64 = arith.mulf %59, %63 : vector<1x8x8xf32>
    %65 = arith.truncf %64 : vector<1x8x8xf32> to vector<1x8x8xbf16>
    %66 = vector.extract_strided_slice %27 {offsets = [0, 0, 16], sizes = [1, 8, 16], strides = [1, 1, 1]} : vector<1x8x32xbf16> to vector<1x8x16xbf16>
    "tpu.trace_start"() <{level = 10 : i32, message = "bqk,bkd->bqd"}> : () -> ()
    %cst_24 = arith.constant dense<0.000000e+00> : vector<1x8x16xf32>
    %67 = tpu.matmul %65, %66, %cst_24 {dimension_numbers = #tpu.dot_dimension_numbers<[2], [1], [1], [2], [0, 0, 0, 1, 1, 2], [0], [0]>} : vector<1x8x8xbf16>, vector<1x8x16xbf16>, vector<1x8x16xf32> -> vector<1x8x16xf32>
    "tpu.trace_stop"() : () -> ()
    %68 = vector.shape_cast %67 : vector<1x8x16xf32> to vector<8x16xf32>
    %c0_25 = arith.constant 0 : index
    %c16 = arith.constant 16 : index
    %69 = vector.load %arg31[%c0_25, %c16] : memref<8x32xf32, #tpu.memory_space<vmem>>, vector<8x16xf32>
    tpu.vector_store %arg31[%c0_25, %c16], %68 {strides = array<i32>} : memref<8x32xf32, #tpu.memory_space<vmem>>, vector<8x16xf32>,
    %c0_26 = arith.constant 0 : index
    %c0_27 = arith.constant 0 : index
    %70 = vector.load %arg31[%c0_26, %c0_27] : memref<8x32xf32, #tpu.memory_space<vmem>>, vector<8x32xf32>
    %71 = arith.truncf %70 : vector<8x32xf32> to vector<8x32xbf16>
    %c0_28 = arith.constant 0 : index
    %c0_29 = arith.constant 0 : index
    %c0_30 = arith.constant 0 : index
    %72 = vector.load %arg11[%c0_28, %c0_29, %c0_30] : memref<1x32x32xbf16, #tpu.memory_space<vmem>>, vector<1x32x32xbf16>
    %73 = vector.shape_cast %72 : vector<1x32x32xbf16> to vector<32x32xbf16>
    %cst_31 = arith.constant dense<0.000000e+00> : vector<8x32xf32>
    %74 = tpu.matmul %71, %73, %cst_31 {dimension_numbers = #tpu.dot_dimension_numbers<[1], [0], [0], [1], [0, 0, 1, 1], [], []>} : vector<8x32xbf16>, vector<32x32xbf16>, vector<8x32xf32> -> vector<8x32xf32>
    %c0_32 = arith.constant 0 : index
    %c0_33 = arith.constant 0 : index
    %c0_34 = arith.constant 0 : index
    %75 = vector.load %arg12[%c0_32, %c0_33, %c0_34] : memref<1x1x32xf32, #tpu.memory_space<vmem>>, vector<1x1x32xf32>
    %76 = vector.shape_cast %75 : vector<1x1x32xf32> to vector<1x32xf32>
    %77 = vector.broadcast %76 : vector<1x32xf32> to vector<8x32xf32>
    %78 = arith.addf %74, %77 : vector<8x32xf32>
    %79 = arith.addf %78, %3 : vector<8x32xf32>
    %c0_35 = arith.constant 0 : index
    %c0_36 = arith.constant 0 : index
    %c0_37 = arith.constant 0 : index
    %80 = vector.load %arg13[%c0_35, %c0_36, %c0_37] : memref<1x1x32xf32, #tpu.memory_space<vmem>>, vector<1x1x32xf32>
    %81 = vector.shape_cast %80 : vector<1x1x32xf32> to vector<1x32xf32>
    %c0_38 = arith.constant 0 : index
    %c0_39 = arith.constant 0 : index
    %c0_40 = arith.constant 0 : index
    %82 = vector.load %arg14[%c0_38, %c0_39, %c0_40] : memref<1x1x32xf32, #tpu.memory_space<vmem>>, vector<1x1x32xf32>
    %83 = vector.shape_cast %82 : vector<1x1x32xf32> to vector<1x32xf32>
    %cst_41 = arith.constant dense<0.000000e+00> : vector<8xf32>
    %84 = vector.multi_reduction <add>, %79, %cst_41 [1] : vector<8x32xf32> to vector<8xf32>
    %85 = vector.shape_cast %84 : vector<8xf32> to vector<8x1xf32>
    %cst_42 = arith.constant 3.200000e+01 : f32
    %86 = vector.broadcast %cst_42 : f32 to vector<8x1xf32>
    %87 = arith.divf %85, %86 : vector<8x1xf32>
    %88 = vector.broadcast %87 : vector<8x1xf32> to vector<8x32xf32>
    %89 = arith.subf %79, %88 : vector<8x32xf32>
    %90 = arith.mulf %89, %89 : vector<8x32xf32>
    %cst_43 = arith.constant dense<0.000000e+00> : vector<8xf32>
    %91 = vector.multi_reduction <add>, %90, %cst_43 [1] : vector<8x32xf32> to vector<8xf32>
    %92 = vector.shape_cast %91 : vector<8xf32> to vector<8x1xf32>
    %cst_44 = arith.constant 3.200000e+01 : f32
    %93 = vector.broadcast %cst_44 : f32 to vector<8x1xf32>
    %94 = arith.divf %92, %93 : vector<8x1xf32>
    %95 = vector.broadcast %87 : vector<8x1xf32> to vector<8x32xf32>
    %96 = arith.subf %79, %95 : vector<8x32xf32>
    %cst_45 = arith.constant 9.99999996E-13 : f32
    %97 = vector.broadcast %cst_45 : f32 to vector<8x1xf32>
    %98 = arith.addf %94, %97 : vector<8x1xf32>
    %99 = math.rsqrt %98 : vector<8x1xf32>
    %100 = vector.broadcast %99 : vector<8x1xf32> to vector<8x32xf32>
    %101 = arith.mulf %96, %100 : vector<8x32xf32>
    %102 = vector.broadcast %81 : vector<1x32xf32> to vector<8x32xf32>
    %103 = arith.mulf %101, %102 : vector<8x32xf32>
    %104 = vector.broadcast %83 : vector<1x32xf32> to vector<8x32xf32>
    %105 = arith.addf %103, %104 : vector<8x32xf32>
    %106 = arith.truncf %105 : vector<8x32xf32> to vector<8x32xbf16>
    %c0_46 = arith.constant 0 : index
    %c0_47 = arith.constant 0 : index
    %c0_48 = arith.constant 0 : index
    %107 = vector.load %arg15[%c0_46, %c0_47, %c0_48] : memref<1x32x64xbf16, #tpu.memory_space<vmem>>, vector<1x32x64xbf16>
    %108 = vector.shape_cast %107 : vector<1x32x64xbf16> to vector<32x64xbf16>
    %cst_49 = arith.constant dense<0.000000e+00> : vector<8x64xf32>
    %109 = tpu.matmul %106, %108, %cst_49 {dimension_numbers = #tpu.dot_dimension_numbers<[1], [0], [0], [1], [0, 0, 1, 1], [], []>} : vector<8x32xbf16>, vector<32x64xbf16>, vector<8x64xf32> -> vector<8x64xf32>
    %c0_50 = arith.constant 0 : index
    %c0_51 = arith.constant 0 : index
    %c0_52 = arith.constant 0 : index
    %110 = vector.load %arg16[%c0_50, %c0_51, %c0_52] : memref<1x1x64xf32, #tpu.memory_space<vmem>>, vector<1x1x64xf32>
    %111 = vector.shape_cast %110 : vector<1x1x64xf32> to vector<1x64xf32>
    %112 = vector.broadcast %111 : vector<1x64xf32> to vector<8x64xf32>
    %113 = arith.addf %109, %112 : vector<8x64xf32>
    %cst_53 = arith.constant 5.000000e-01 : f32
    %114 = vector.broadcast %cst_53 : f32 to vector<8x64xf32>
    %115 = arith.mulf %114, %113 : vector<8x64xf32>
    %cst_54 = arith.constant 4.471500e-02 : f32
    %116 = vector.broadcast %cst_54 : f32 to vector<8x64xf32>
    %117 = arith.mulf %116, %113 : vector<8x64xf32>
    %118 = arith.mulf %117, %113 : vector<8x64xf32>
    %119 = arith.mulf %118, %113 : vector<8x64xf32>
    %120 = arith.addf %113, %119 : vector<8x64xf32>
    %cst_55 = arith.constant 0.797884583 : f32
    %121 = vector.broadcast %cst_55 : f32 to vector<8x64xf32>
    %122 = arith.mulf %121, %120 : vector<8x64xf32>
    %123 = math.tanh %122 : vector<8x64xf32>
    %cst_56 = arith.constant 1.000000e+00 : f32
    %124 = vector.broadcast %cst_56 : f32 to vector<8x64xf32>
    %125 = arith.addf %124, %123 : vector<8x64xf32>
    %126 = arith.mulf %115, %125 : vector<8x64xf32>
    %127 = arith.truncf %126 : vector<8x64xf32> to vector<8x64xbf16>
    %c0_57 = arith.constant 0 : index
    %c0_58 = arith.constant 0 : index
    %c0_59 = arith.constant 0 : index
    %128 = vector.load %arg17[%c0_57, %c0_58, %c0_59] : memref<1x64x32xbf16, #tpu.memory_space<vmem>>, vector<1x64x32xbf16>
    %129 = vector.shape_cast %128 : vector<1x64x32xbf16> to vector<64x32xbf16>
    %cst_60 = arith.constant dense<0.000000e+00> : vector<8x32xf32>
    %130 = tpu.matmul %127, %129, %cst_60 {dimension_numbers = #tpu.dot_dimension_numbers<[1], [0], [0], [1], [0, 0, 1, 1], [], []>} : vector<8x64xbf16>, vector<64x32xbf16>, vector<8x32xf32> -> vector<8x32xf32>
    %c0_61 = arith.constant 0 : index
    %c0_62 = arith.constant 0 : index
    %c0_63 = arith.constant 0 : index
    %131 = vector.load %arg18[%c0_61, %c0_62, %c0_63] : memref<1x1x32xf32, #tpu.memory_space<vmem>>, vector<1x1x32xf32>
    %132 = vector.shape_cast %131 : vector<1x1x32xf32> to vector<1x32xf32>
    %133 = vector.broadcast %132 : vector<1x32xf32> to vector<8x32xf32>
    %134 = arith.addf %130, %133 : vector<8x32xf32>
    %135 = arith.addf %134, %105 : vector<8x32xf32>
    %c0_64 = arith.constant 0 : index
    %c0_65 = arith.constant 0 : index
    %c0_66 = arith.constant 0 : index
    %136 = vector.load %arg19[%c0_64, %c0_65, %c0_66] : memref<1x1x32xf32, #tpu.memory_space<vmem>>, vector<1x1x32xf32>
    %137 = vector.shape_cast %136 : vector<1x1x32xf32> to vector<1x32xf32>
    %c0_67 = arith.constant 0 : index
    %c0_68 = arith.constant 0 : index
    %c0_69 = arith.constant 0 : index
    %138 = vector.load %arg20[%c0_67, %c0_68, %c0_69] : memref<1x1x32xf32, #tpu.memory_space<vmem>>, vector<1x1x32xf32>
    %139 = vector.shape_cast %138 : vector<1x1x32xf32> to vector<1x32xf32>
    %cst_70 = arith.constant dense<0.000000e+00> : vector<8xf32>
    %140 = vector.multi_reduction <add>, %135, %cst_70 [1] : vector<8x32xf32> to vector<8xf32>
    %141 = vector.shape_cast %140 : vector<8xf32> to vector<8x1xf32>
    %cst_71 = arith.constant 3.200000e+01 : f32
    %142 = vector.broadcast %cst_71 : f32 to vector<8x1xf32>
    %143 = arith.divf %141, %142 : vector<8x1xf32>
    %144 = vector.broadcast %143 : vector<8x1xf32> to vector<8x32xf32>
    %145 = arith.subf %135, %144 : vector<8x32xf32>
    %146 = arith.mulf %145, %145 : vector<8x32xf32>
    %cst_72 = arith.constant dense<0.000000e+00> : vector<8xf32>
    %147 = vector.multi_reduction <add>, %146, %cst_72 [1] : vector<8x32xf32> to vector<8xf32>
    %148 = vector.shape_cast %147 : vector<8xf32> to vector<8x1xf32>
    %cst_73 = arith.constant 3.200000e+01 : f32
    %149 = vector.broadcast %cst_73 : f32 to vector<8x1xf32>
    %150 = arith.divf %148, %149 : vector<8x1xf32>
    %151 = vector.broadcast %143 : vector<8x1xf32> to vector<8x32xf32>
    %152 = arith.subf %135, %151 : vector<8x32xf32>
    %cst_74 = arith.constant 9.99999996E-13 : f32
    %153 = vector.broadcast %cst_74 : f32 to vector<8x1xf32>
    %154 = arith.addf %150, %153 : vector<8x1xf32>
    %155 = math.rsqrt %154 : vector<8x1xf32>
    %156 = vector.broadcast %155 : vector<8x1xf32> to vector<8x32xf32>
    %157 = arith.mulf %152, %156 : vector<8x32xf32>
    %158 = vector.broadcast %137 : vector<1x32xf32> to vector<8x32xf32>
    %159 = arith.mulf %157, %158 : vector<8x32xf32>
    %160 = vector.broadcast %139 : vector<1x32xf32> to vector<8x32xf32>
    %161 = arith.addf %159, %160 : vector<8x32xf32>
    %c0_75 = arith.constant 0 : index
    %c0_76 = arith.constant 0 : index
    %162 = vector.load %arg30[%c0_75, %c0_76] : memref<8x32xf32, #tpu.memory_space<vmem>>, vector<8x32xf32>
    tpu.vector_store %arg30[%c0_75, %c0_76], %161 {strides = array<i32>} : memref<8x32xf32, #tpu.memory_space<vmem>>, vector<8x32xf32>,
    %c1_i32 = arith.constant 1 : i32
    %163 = arith.cmpi eq, %arg1, %c1_i32 : i32
    %164 = arith.extui %163 : i1 to i32
    %c0_i32_77 = arith.constant 0 : i32
    %165 = arith.cmpi ne, %164, %c0_i32_77 : i32
    scf.if %165 {
      %166 = vector.shape_cast %161 : vector<8x32xf32> to vector<1x8x32xf32>
      %167 = vector.extract_strided_slice %166 {offsets = [0, 0, 0], sizes = [1, 1, 32], strides = [1, 1, 1]} : vector<1x8x32xf32> to vector<1x1x32xf32>
      %168 = vector.shape_cast %167 : vector<1x1x32xf32> to vector<1x32xf32>
      %169 = arith.truncf %168 : vector<1x32xf32> to vector<1x32xbf16>
      %c0_78 = arith.constant 0 : index
      %c0_79 = arith.constant 0 : index
      %170 = vector.load %arg21[%c0_78, %c0_79] : memref<32x32xbf16, #tpu.memory_space<vmem>>, vector<32x32xbf16>
      %cst_80 = arith.constant dense<0.000000e+00> : vector<1x32xf32>
      %171 = tpu.matmul %169, %170, %cst_80 {dimension_numbers = #tpu.dot_dimension_numbers<[1], [0], [0], [1], [0, 0, 1, 1], [], []>} : vector<1x32xbf16>, vector<32x32xbf16>, vector<1x32xf32> -> vector<1x32xf32>
      %c0_81 = arith.constant 0 : index
      %c0_82 = arith.constant 0 : index
      %172 = vector.load %arg22[%c0_81, %c0_82] : memref<1x32xf32, #tpu.memory_space<vmem>>, vector<1x32xf32>
      %173 = arith.addf %171, %172 : vector<1x32xf32>
      %174 = math.tanh %173 : vector<1x32xf32>
      %c0_83 = arith.constant 0 : index
      %c0_84 = arith.constant 0 : index
      %c0_85 = arith.constant 0 : index
      %175 = vector.load %arg4[%c0_83, %c0_84, %c0_85] : memref<1x1x4xf32, #tpu.memory_space<vmem>>, vector<1x1x4xf32>
      %176 = vector.shape_cast %175 : vector<1x1x4xf32> to vector<1x4xf32>
      %177 = arith.truncf %174 : vector<1x32xf32> to vector<1x32xbf16>
      %c0_86 = arith.constant 0 : index
      %c0_87 = arith.constant 0 : index
      %178 = vector.load %arg23[%c0_86, %c0_87] : memref<32x32xbf16, #tpu.memory_space<vmem>>, vector<32x32xbf16>
      %cst_88 = arith.constant dense<0.000000e+00> : vector<1x32xf32>
      %179 = tpu.matmul %177, %178, %cst_88 {dimension_numbers = #tpu.dot_dimension_numbers<[1], [0], [0], [1], [0, 0, 1, 1], [], []>} : vector<1x32xbf16>, vector<32x32xbf16>, vector<1x32xf32> -> vector<1x32xf32>
      %180 = arith.truncf %176 : vector<1x4xf32> to vector<1x4xbf16>
      %c0_89 = arith.constant 0 : index
      %c0_90 = arith.constant 0 : index
      %181 = vector.load %arg24[%c0_89, %c0_90] : memref<4x32xbf16, #tpu.memory_space<vmem>>, vector<4x32xbf16>
      %cst_91 = arith.constant dense<0.000000e+00> : vector<1x32xf32>
      %182 = tpu.matmul %180, %181, %cst_91 {dimension_numbers = #tpu.dot_dimension_numbers<[1], [0], [0], [1], [0, 0, 1, 1], [], []>} : vector<1x4xbf16>, vector<4x32xbf16>, vector<1x32xf32> -> vector<1x32xf32>
      %183 = arith.addf %179, %182 : vector<1x32xf32>
      %c0_92 = arith.constant 0 : index
      %c0_93 = arith.constant 0 : index
      %184 = vector.load %arg25[%c0_92, %c0_93] : memref<1x32xf32, #tpu.memory_space<vmem>>, vector<1x32xf32>
      %185 = arith.addf %183, %184 : vector<1x32xf32>
      %cst_94 = arith.constant 0.000000e+00 : f32
      %186 = vector.broadcast %cst_94 : f32 to vector<1x32xf32>
      %187 = arith.maximumf %185, %186 : vector<1x32xf32>
      %188 = arith.truncf %187 : vector<1x32xf32> to vector<1x32xbf16>
      %c0_95 = arith.constant 0 : index
      %c0_96 = arith.constant 0 : index
      %189 = vector.load %arg26[%c0_95, %c0_96] : memref<32x1xbf16, #tpu.memory_space<vmem>>, vector<32x1xbf16>
      %cst_97 = arith.constant dense<0.000000e+00> : vector<1x1xf32>
      %190 = tpu.matmul %188, %189, %cst_97 {dimension_numbers = #tpu.dot_dimension_numbers<[1], [0], [0], [1], [0, 0, 1, 1], [], []>} : vector<1x32xbf16>, vector<32x1xbf16>, vector<1x1xf32> -> vector<1x1xf32>
      %c0_98 = arith.constant 0 : index
      %c0_99 = arith.constant 0 : index
      %191 = vector.load %arg27[%c0_98, %c0_99] : memref<1x1xf32, #tpu.memory_space<vmem>>, vector<1x1xf32>
      %192 = arith.addf %190, %191 : vector<1x1xf32>
      %193 = vector.shape_cast %192 : vector<1x1xf32> to vector<1x1x1xf32>
      %c0_100 = arith.constant 0 : index
      %c0_101 = arith.constant 0 : index
      %c0_102 = arith.constant 0 : index
      %194 = vector.load %arg28[%c0_100, %c0_101, %c0_102] : memref<1x1x1xf32, #tpu.memory_space<vmem>>, vector<1x1x1xf32>
      tpu.vector_store %arg28[%c0_100, %c0_101, %c0_102], %193 {strides = array<i32>} : memref<1x1x1xf32, #tpu.memory_space<vmem>>, vector<1x1x1xf32>,
      %c0_103 = arith.constant 0 : index
      %c0_104 = arith.constant 0 : index
      %c0_105 = arith.constant 0 : index
      %195 = vector.load %arg5[%c0_103, %c0_104, %c0_105] : memref<1x1x1xf32, #tpu.memory_space<vmem>>, vector<1x1x1xf32>
      %196 = vector.shape_cast %195 : vector<1x1x1xf32> to vector<1x1xf32>
      %c0_106 = arith.constant 0 : index
      %c0_107 = arith.constant 0 : index
      %c0_108 = arith.constant 0 : index
      %197 = vector.load %arg6[%c0_106, %c0_107, %c0_108] : memref<1x1x1xf32, #tpu.memory_space<vmem>>, vector<1x1x1xf32>
      %198 = vector.shape_cast %197 : vector<1x1x1xf32> to vector<1x1xf32>
      %cst_109 = arith.constant 0.000000e+00 : f32
      %199 = vector.broadcast %cst_109 : f32 to vector<1x1xf32>
      %200 = arith.maximumf %192, %199 : vector<1x1xf32>
      %201 = arith.mulf %192, %196 : vector<1x1xf32>
      %202 = arith.subf %200, %201 : vector<1x1xf32>
      %203 = math.absf %192 : vector<1x1xf32>
      %cst_110 = arith.constant 0.000000e+00 : f32
      %204 = vector.broadcast %cst_110 : f32 to vector<1x1xf32>
      %205 = arith.subf %204, %203 : vector<1x1xf32>
      %206 = math.exp %205 : vector<1x1xf32>
      %cst_111 = arith.constant 1.000000e+00 : f32
      %207 = vector.broadcast %cst_111 : f32 to vector<1x1xf32>
      %208 = arith.addf %207, %206 : vector<1x1xf32>
      %209 = math.log %208 : vector<1x1xf32>
      %210 = arith.addf %202, %209 : vector<1x1xf32>
      %211 = arith.mulf %198, %210 : vector<1x1xf32>
      %212 = vector.shape_cast %211 : vector<1x1xf32> to vector<1x1x1xf32>
      %c0_112 = arith.constant 0 : index
      %c0_113 = arith.constant 0 : index
      %c0_114 = arith.constant 0 : index
      %213 = vector.load %arg29[%c0_112, %c0_113, %c0_114] : memref<1x1x1xf32, #tpu.memory_space<vmem>>, vector<1x1x1xf32>
      tpu.vector_store %arg29[%c0_112, %c0_113, %c0_114], %212 {strides = array<i32>} : memref<1x1x1xf32, #tpu.memory_space<vmem>>, vector<1x1x1xf32>,
    } else {
    }
    return
  }
  func.func @transform_0(%arg0: i32, %arg1: i32) -> (i32, i32, i32) {
    %c0_i32 = arith.constant 0 : i32
    %c0_i32_0 = arith.constant 0 : i32
    %c0_i32_1 = arith.constant 0 : i32
    return %arg0, %c0_i32, %c0_i32_0 : i32, i32, i32
  }
  func.func @transform_1(%arg0: i32, %arg1: i32) -> (i32, i32, i32) {
    %c0_i32 = arith.constant 0 : i32
    %c0_i32_0 = arith.constant 0 : i32
    %c0_i32_1 = arith.constant 0 : i32
    return %arg0, %c0_i32, %c0_i32_0 : i32, i32, i32
  }
  func.func @transform_2(%arg0: i32, %arg1: i32) -> (i32, i32, i32) {
    %c0_i32 = arith.constant 0 : i32
    %c0_i32_0 = arith.constant 0 : i32
    %c0_i32_1 = arith.constant 0 : i32
    return %arg0, %c0_i32, %c0_i32_0 : i32, i32, i32
  }
  func.func @transform_3(%arg0: i32, %arg1: i32) -> (i32, i32, i32) {
    %c0_i32 = arith.constant 0 : i32
    %c0_i32_0 = arith.constant 0 : i32
    %c0_i32_1 = arith.constant 0 : i32
    return %arg0, %c0_i32, %c0_i32_0 : i32, i32, i32
  }
  func.func @transform_4(%arg0: i32, %arg1: i32) -> (i32, i32, i32) {
    %c0_i32 = arith.constant 0 : i32
    %c0_i32_0 = arith.constant 0 : i32
    %c0_i32_1 = arith.constant 0 : i32
    return %arg0, %c0_i32, %c0_i32_0 : i32, i32, i32
  }
  func.func @transform_5(%arg0: i32, %arg1: i32) -> (i32, i32) {
    %c0_i32 = arith.constant 0 : i32
    %c0_i32_0 = arith.constant 0 : i32
    %c0_i32_1 = arith.constant 0 : i32
    return %c0_i32, %c0_i32_0 : i32, i32
  }
  func.func @transform_6(%arg0: i32, %arg1: i32) -> (i32, i32) {
    %c0_i32 = arith.constant 0 : i32
    %c0_i32_0 = arith.constant 0 : i32
    %c0_i32_1 = arith.constant 0 : i32
    return %c0_i32, %c0_i32_0 : i32, i32
  }
  func.func @transform_7(%arg0: i32, %arg1: i32) -> (i32, i32, i32) {
    %c0_i32 = arith.constant 0 : i32
    %c0_i32_0 = arith.constant 0 : i32
    %c0_i32_1 = arith.constant 0 : i32
    return %arg1, %c0_i32, %c0_i32_0 : i32, i32, i32
  }
  func.func @transform_8(%arg0: i32, %arg1: i32) -> (i32, i32, i32) {
    %c0_i32 = arith.constant 0 : i32
    %c0_i32_0 = arith.constant 0 : i32
    %c0_i32_1 = arith.constant 0 : i32
    return %arg1, %c0_i32, %c0_i32_0 : i32, i32, i32
  }
  func.func @transform_9(%arg0: i32, %arg1: i32) -> (i32, i32, i32) {
    %c0_i32 = arith.constant 0 : i32
    %c0_i32_0 = arith.constant 0 : i32
    %c0_i32_1 = arith.constant 0 : i32
    return %arg1, %c0_i32, %c0_i32_0 : i32, i32, i32
  }
  func.func @transform_10(%arg0: i32, %arg1: i32) -> (i32, i32, i32) {
    %c0_i32 = arith.constant 0 : i32
    %c0_i32_0 = arith.constant 0 : i32
    %c0_i32_1 = arith.constant 0 : i32
    return %arg1, %c0_i32, %c0_i32_0 : i32, i32, i32
  }
  func.func @transform_11(%arg0: i32, %arg1: i32) -> (i32, i32, i32) {
    %c0_i32 = arith.constant 0 : i32
    %c0_i32_0 = arith.constant 0 : i32
    %c0_i32_1 = arith.constant 0 : i32
    return %arg1, %c0_i32, %c0_i32_0 : i32, i32, i32
  }
  func.func @transform_12(%arg0: i32, %arg1: i32) -> (i32, i32, i32) {
    %c0_i32 = arith.constant 0 : i32
    %c0_i32_0 = arith.constant 0 : i32
    %c0_i32_1 = arith.constant 0 : i32
    return %arg1, %c0_i32, %c0_i32_0 : i32, i32, i32
  }
  func.func @transform_13(%arg0: i32, %arg1: i32) -> (i32, i32, i32) {
    %c0_i32 = arith.constant 0 : i32
    %c0_i32_0 = arith.constant 0 : i32
    %c0_i32_1 = arith.constant 0 : i32
    return %arg1, %c0_i32, %c0_i32_0 : i32, i32, i32
  }
  func.func @transform_14(%arg0: i32, %arg1: i32) -> (i32, i32, i32) {
    %c0_i32 = arith.constant 0 : i32
    %c0_i32_0 = arith.constant 0 : i32
    %c0_i32_1 = arith.constant 0 : i32
    return %arg1, %c0_i32, %c0_i32_0 : i32, i32, i32
  }
  func.func @transform_15(%arg0: i32, %arg1: i32) -> (i32, i32, i32) {
    %c0_i32 = arith.constant 0 : i32
    %c0_i32_0 = arith.constant 0 : i32
    %c0_i32_1 = arith.constant 0 : i32
    return %arg1, %c0_i32, %c0_i32_0 : i32, i32, i32
  }
  func.func @transform_16(%arg0: i32, %arg1: i32) -> (i32, i32, i32) {
    %c0_i32 = arith.constant 0 : i32
    %c0_i32_0 = arith.constant 0 : i32
    %c0_i32_1 = arith.constant 0 : i32
    return %arg1, %c0_i32, %c0_i32_0 : i32, i32, i32
  }
  func.func @transform_17(%arg0: i32, %arg1: i32) -> (i32, i32, i32) {
    %c0_i32 = arith.constant 0 : i32
    %c0_i32_0 = arith.constant 0 : i32
    %c0_i32_1 = arith.constant 0 : i32
    return %arg1, %c0_i32, %c0_i32_0 : i32, i32, i32
  }
  func.func @transform_18(%arg0: i32, %arg1: i32) -> (i32, i32, i32) {
    %c0_i32 = arith.constant 0 : i32
    %c0_i32_0 = arith.constant 0 : i32
    %c0_i32_1 = arith.constant 0 : i32
    return %arg1, %c0_i32, %c0_i32_0 : i32, i32, i32
  }
  func.func @transform_19(%arg0: i32, %arg1: i32) -> (i32, i32) {
    %c0_i32 = arith.constant 0 : i32
    %c0_i32_0 = arith.constant 0 : i32
    %c0_i32_1 = arith.constant 0 : i32
    return %c0_i32, %c0_i32_0 : i32, i32
  }
  func.func @transform_20(%arg0: i32, %arg1: i32) -> (i32, i32) {
    %c0_i32 = arith.constant 0 : i32
    %c0_i32_0 = arith.constant 0 : i32
    %c0_i32_1 = arith.constant 0 : i32
    return %c0_i32, %c0_i32_0 : i32, i32
  }
  func.func @transform_21(%arg0: i32, %arg1: i32) -> (i32, i32) {
    %c0_i32 = arith.constant 0 : i32
    %c0_i32_0 = arith.constant 0 : i32
    %c0_i32_1 = arith.constant 0 : i32
    return %c0_i32, %c0_i32_0 : i32, i32
  }
  func.func @transform_22(%arg0: i32, %arg1: i32) -> (i32, i32) {
    %c0_i32 = arith.constant 0 : i32
    %c0_i32_0 = arith.constant 0 : i32
    %c0_i32_1 = arith.constant 0 : i32
    return %c0_i32, %c0_i32_0 : i32, i32
  }
  func.func @transform_23(%arg0: i32, %arg1: i32) -> (i32, i32) {
    %c0_i32 = arith.constant 0 : i32
    %c0_i32_0 = arith.constant 0 : i32
    %c0_i32_1 = arith.constant 0 : i32
    return %c0_i32, %c0_i32_0 : i32, i32
  }
  func.func @transform_24(%arg0: i32, %arg1: i32) -> (i32, i32) {
    %c0_i32 = arith.constant 0 : i32
    %c0_i32_0 = arith.constant 0 : i32
    %c0_i32_1 = arith.constant 0 : i32
    return %c0_i32, %c0_i32_0 : i32, i32
  }
  func.func @transform_25(%arg0: i32, %arg1: i32) -> (i32, i32) {
    %c0_i32 = arith.constant 0 : i32
    %c0_i32_0 = arith.constant 0 : i32
    %c0_i32_1 = arith.constant 0 : i32
    return %c0_i32, %c0_i32_0 : i32, i32
  }
  func.func @transform_26(%arg0: i32, %arg1: i32) -> (i32, i32, i32) {
    %c0_i32 = arith.constant 0 : i32
    %c0_i32_0 = arith.constant 0 : i32
    %c0_i32_1 = arith.constant 0 : i32
    return %arg0, %c0_i32, %c0_i32_0 : i32, i32, i32
  }
  func.func @transform_27(%arg0: i32, %arg1: i32) -> (i32, i32, i32) {
    %c0_i32 = arith.constant 0 : i32
    %c0_i32_0 = arith.constant 0 : i32
    %c0_i32_1 = arith.constant 0 : i32
    return %arg0, %c0_i32, %c0_i32_0 : i32, i32, i32
  }
}

</mosaic_0001>

<bundles_post_ra>
// kernel: forward.1
= control target key start
LH: loop header
LB: loop body
LE: loop exit
PB: predicated region body
PF: predicated region fallthrough
CT: control target
= control target key end

     0   :  { %s2686_s30 = smov 0   ;;  %s2692_s28 = smov 0   ;;  %s3008_s0 = inlined_call_operand.vmem [shape: f32[2,8,32], index: 0, kind: input, shape index: {}]   ;;  %s3009_s1 = inlined_call_operand.vmem [shape: f32[2,1,8], index: 1, kind: input, shape index: {}]   ;;  %s3010_s2 = inlined_call_operand.vmem [shape: f32[2,1,4], index: 2, kind: input, shape index: {}]   ;;  %s3011_s3 = inlined_call_operand.vmem [shape: f32[2,1,1], index: 3, kind: input, shape index: {}]   ;;  %s3012_s4 = inlined_call_operand.vmem [shape: f32[2,1,1], index: 4, kind: input, shape index: {}]   ;;  %s3013_s5 = inlined_call_operand.vmem [shape: f32[1,32], index: 5, kind: input, shape index: {}]   ;;  %s3014_s6 = inlined_call_operand.vmem [shape: f32[1,32], index: 6, kind: input, shape index: {}]   ;;  %s3015_s7 = inlined_call_operand.vmem [shape: bf16[2,32,96], index: 7, kind: input, shape index: {}]   ;;  %s3016_s8 = inlined_call_operand.vmem [shape: f32[2,1,96], index: 8, kind: input, shape index: {}]   ;;  %s3017_s9 = inlined_call_operand.vmem [shape: bf16[2,32,32], index: 9, kind: input, shape index: {}]   ;;  %s3018_s10 = inlined_call_operand.vmem [shape: f32[2,1,32], index: 10, kind: input, shape index: {}]   ;;  %s3019_s11 = inlined_call_operand.vmem [shape: f32[2,1,32], index: 11, kind: input, shape index: {}]   ;;  %s3020_s12 = inlined_call_operand.vmem [shape: f32[2,1,32], index: 12, kind: input, shape index: {}]   ;;  %s3021_s13 = inlined_call_operand.vmem [shape: bf16[2,32,64], index: 13, kind: input, shape index: {}]   ;;  %s3022_s14 = inlined_call_operand.vmem [shape: f32[2,1,64], index: 14, kind: input, shape index: {}]   ;;  %s3023_s15 = inlined_call_operand.vmem [shape: bf16[2,64,32], index: 15, kind: input, shape index: {}]   ;;  %s3024_s16 = inlined_call_operand.vmem [shape: f32[2,1,32], index: 16, kind: input, shape index: {}]   ;;  %s3025_s17 = inlined_call_operand.vmem [shape: f32[2,1,32], index: 17, kind: input, shape index: {}]   ;;  %s3026_s18 = inlined_call_operand.vmem [shape: f32[2,1,32], index: 18, kind: input, shape index: {}]   ;;  %s3027_s19 = inlined_call_operand.vmem [shape: bf16[32,32], index: 19, kind: input, shape index: {}]   ;;  %s3028_s20 = inlined_call_operand.vmem [shape: f32[1,32], index: 20, kind: input, shape index: {}]   ;;  %s3029_s21 = inlined_call_operand.vmem [shape: bf16[32,32], index: 21, kind: input, shape index: {}]   ;;  %s3030_s22 = inlined_call_operand.vmem [shape: bf16[4,32], index: 22, kind: input, shape index: {}]   ;;  %s3031_s23 = inlined_call_operand.vmem [shape: f32[1,32], index: 23, kind: input, shape index: {}]   ;;  %s3032_s24 = inlined_call_operand.vmem [shape: bf16[32,1], index: 24, kind: input, shape index: {}]   ;;  %s3033_s25 = inlined_call_operand.<no memory space> [shape: f32[1,1], index: 25, kind: input, shape index: {}]   ;;  %s3034_s26 = inlined_call_operand.vmem [shape: f32[2,1,1], index: 26, kind: output, shape index: {0}]   ;;  %s3035_s27 = inlined_call_operand.vmem [shape: f32[2,1,1], index: 27, kind: output, shape index: {1}]  }
   0x1   :  { %3043 = sst [smem:[#allocation11_spill]] %s3008_s0  ;;  %v33_v0 = vstv %s3033_s25 }
   0x2   :  { %3044 = sst [smem:[#allocation12_spill]] %s3009_s1  ;;  %34 = vst [vmem:[#allocation4] sm:$0x1] %v33_v0 }
   0x3   :  { %3045 = sst [smem:[#allocation13_spill]] %s3010_s2 }
   0x4   :  { %3046 = sst [smem:[#allocation14_spill]] %s3011_s3 }
   0x5   :  { %3047 = sst [smem:[#allocation15_spill]] %s3012_s4 }
   0x6   :  { %3048 = sst [smem:[#allocation16_spill]] %s3013_s5  ;;  %s2690_s5 = smov 0  }
   0x7   :  { %3049 = sst [smem:[#allocation17_spill]] %s3014_s6 }
   0x8   :  { %3050 = sst [smem:[#allocation18_spill]] %s3015_s7 }
   0x9   :  { %3051 = sst [smem:[#allocation19_spill]] %s3016_s8  ;;  %s2684_s8 = smov 0  }
   0xa   :  { %3052 = sst [smem:[#allocation20_spill]] %s3017_s9  ;;  %s2688_s9 = smov 0  }
   0xb   :  { %3053 = sst [smem:[#allocation21_spill]] %s3018_s10 }
   0xc   :  { %3054 = sst [smem:[#allocation22_spill]] %s3019_s11 }
   0xd   :  { %3055 = sst [smem:[#allocation23_spill]] %s3021_s13 }
   0xe   :  { %3056 = sst [smem:[#allocation24_spill]] %s3027_s19 }
   0xf   :  { %3057 = sst [smem:[#allocation25_spill]] %s3028_s20 }
  0x10   :  { %3058 = sst [smem:[#allocation26_spill]] %s3029_s21 }
  0x11   :  { %3059 = sst [smem:[#allocation27_spill]] %s3030_s22 }
  0x12   :  { %3060 = sst [smem:[#allocation28_spill]] %s3031_s23 }
  0x13   :  { %3061 = sst [smem:[#allocation29_spill]] %s3032_s24 }
  0x14   :  { %3062 = sst [smem:[#allocation30_spill]] %s3034_s26 }
  0x15   :  { %3063 = sst [smem:[#allocation31_spill]] %s3035_s27 }
  0x16 LB: > { %3064 = sst [smem:[#allocation5_spill]] %s2513_s8  ;;  %s49_s25 = sadd.s32 1, %s2521_s9  ;;  %s2529_s28 = sphi %s2692_s28, %s40_s28   ;;  %s2525_s5 = sphi %s2690_s5, %s3116_s5   ;;  %s2521_s9 = sphi %s2688_s9, %s3115_s9   ;;  %s2517_s30 = sphi %s2686_s30, %s3114_s30   ;;  %s2513_s8 = sphi %s2684_s8, %s3113_s8  }
  0x17   : > { %3065 = sst [smem:[#allocation6_spill]] %s2521_s9  ;;  %s52_s0 = sadd.s32 1, %s2525_s5 }
  0x18   : > { %3066 = sst [smem:[#allocation7_spill]] %s2525_s5  ;;  %p50_p0 = scmp.ge.s32.totalorder %s49_s25, 2 }
  0x19   : > { %3067 = sst [smem:[#allocation8_spill]] %s2529_s28  ;;  %p2224_p1 = scmp.ge.s32.totalorder %s2529_s28, 1 }
  0x1a   : > { %p889_p2 = scmp.lt.s32.totalorder %s2529_s28, 5  ;;  %s3118_s25 = smov (%p50_p0, %s49_s25), 0 }
  0x1b   : > { %3068 = sst [smem:[#allocation9_spill]] %s3118_s25  ;;  %s3120_s0 = smov (!%p50_p0, %s52_s0), %s2525_s5 }
  0x1c   : > { %p890_p3 = pnand %p2224_p1, %p889_p2  ;;  %p54_p4 = scmp.ge.s32.totalorder %s3120_s0, 2 }
  0x1d   : > { %p1017_p5 = scmp.lt.s32.totalorder (!%p890_p3), %s2517_s30, 1  ;;  %p1033_p6 = scmp.lt.s32.totalorder (!%p890_p3), %s2513_s8, 1 }
  0x1e   : > { %s3122_s0 = smov (%p54_p4, %s3120_s0), 0  ;;  %893 = sbr.rel (%p890_p3) target bundleno = 3431 (0xd67), region = 124 }
  0x1f   : > { %3069 = sst [smem:[#allocation10_spill]] %s3122_s0 }
  0x20   : > { %s3071_s4 = sld [smem:[#allocation11_spill]] (!%p890_p3) }
  0x21   : > { %s3076_s25 = sld [smem:[#allocation18_spill]] (!%p890_p3) }
  0x22   : > { %s3077_s24 = sld [smem:[#allocation20_spill]] (!%p890_p3) }
  0x23   : > { %s3124_s30 = smov (!%p1017_p5, %s2517_s30), 1  ;;  %s3080_s13 = sld [smem:[#allocation23_spill]] }
  0x24   : > { %s2720_s10 = scalar_select %p1033_p6, %s2513_s8, 1 }
  0x25   : > { %s2225_s29 = sshll.u32 %s3124_s30, 3 }
  0x26   : > { %s1020_s0 = scalar_lea.vmem %s3071_s4, %s2225_s29  ;;  %s2276_s6 = sshll.u32 %s2720_s10, 4 }
  0x27   : > { %s2750_s9 = scalar_lea.vmem %s3076_s25, %s2276_s6  ;;  %s2279_s7 = sshll.u32 %s2720_s10, 5 }
  0x28   : > { %s2755_s20 = scalar_lea.vmem %s3077_s24, %s2276_s6  ;;  %s2782_s22 = scalar_lea.vmem %s3023_s15, %s2279_s7 }
  0x29   : > { %s2772_s25 = scalar_lea.vmem %s3080_s13, %s2276_s6  ;;  %s1070_s1 = scalar_lea.vmem %s3024_s16, %s2720_s10 }
  0x2a   : > { %s1073_s4 = scalar_lea.vmem %s3025_s17, %s2720_s10  ;;  %s1076_s29 = scalar_lea.vmem %s3026_s18, %s2720_s10 }
  0x2b   : > { %s3081_s24 = sld [smem:[#allocation30_spill]] }
  0x2c   : > { %s3082_s7 = sld [smem:[#allocation31_spill]] }
  0x2d   : > { %s3083_s13 = sld [smem:[#allocation5_spill]] }
  0x31   : > { %s1079_s26 = scalar_lea.vmem %s3081_s24, %s3124_s30 }
  0x32   : > { %s1082_s19 = scalar_lea.vmem %s3082_s7, %s3124_s30 }
  0x33   : > { %p2234_p7 = scmp.ne.s32.totalorder %s3083_s13, 0 }
  0x34   : > { %s3084_s24 = sld [smem:[#allocation16_spill]] (!%p2234_p7) }
  0x35   : > { %1087 = sbr.rel (%p2234_p7) target bundleno = 368 (0x170), region = 128  ;;  %s3085_s2 = sld [smem:[#allocation17_spill]] (!%p2234_p7) }
  0x3a   : > { %v1088_v1 = vld [vmem:[%s1020_s0] sm:$0xff]  ;;  %vm1091_vm0 = vcmask 261120  }
  0x3b   : > { %v1092_v2 = vsel %vm1091_vm0, %v1088_v1, 0.0  ;;  %v2235_v12 = vld [vmem:[%s3084_s24] ss:$0 sm:$0xff] }
  0x3c   : > { %1093 = vadd.xlane.f32.xlu0 %v1092_v2  ;;  %v2236_v14 = vld [vmem:[%s3085_s2] ss:$0 sm:$0xff] }
  0xc5   : > { %v1094_v3 = vpop.xlane.xlu0 %1093 }
  0xc6   : > { %v1096_v4 = vmul.f32 0.03125, %v1094_v3 }
  0xc8   : > { %v1097_v5 = vsub.f32 %v1088_v1, %v1096_v4 }
  0xca   : > { %v1098_v6 = vmul.f32 %v1097_v5, %v1097_v5 }
  0xcc   : > { %v1099_v7 = vsel %vm1091_vm0, %v1098_v6, 0.0 }
  0xcd   : > { %1100 = vadd.xlane.f32.xlu0 %v1099_v7 }
 0x156   : > { %v1101_v8 = vpop.xlane.xlu0 %1100 }
 0x157   : > { %v1102_v9 = vmul.f32 0.03125, %v1101_v8 }
 0x159   : > { %v1103_v10 = vadd.f32 1e-12, %v1102_v9 }
 0x15b   : > { %2453 = vrsqrt.f32 %v1103_v10 }
 0x168   : > { %v2454_v11 = vpop.eup %2453 }
 0x169   : > { %v1105_v13 = vmul.f32 %v2454_v11, %v1097_v5 }
 0x16b   : > { %v1112_v15 = vmul.f32 %v2235_v12, %v1105_v13 }
 0x16d   : > { %v1119_v16 = vadd.f32 %v2236_v14, %v1112_v15 }
 0x16f   : > { %1120 = vst.msk [vmem:[#allocation2] sm:$0xff] %vm1091_vm0, %v1119_v16 }
 0x170 PF: > { %v2455_v17 = vld [vmem:[%s2750_s9 + $0x8] sm:$0xff]   ;;  %v2531_v18 = vmov 0.0   ;;  %v2456_v19 = vld [vmem:[%s2750_s9] sm:$0xff]   ;;  %vm2532_vm1 = vmmov 0   ;;  %vm1155_vm2 = vcmask 261120   ;;  %s3086_s3 = sld [smem:[#allocation19_spill]]  ;;  %v1126_v34 = vlaneseq }
 0x171   : > { %2313 = vmatprep.subr.bf16.mxu0 %v2531_v18  ;;  %2321 = vmatprep.subr.bf16.mxu1 %v2531_v18  ;;  %s2533_s5 = smov 112   ;;  %s2534_s28 = smov 96   ;;  %vm1203_vm3 = vcmask 130048   ;;  %vm1252_vm4 = vcmask 64512   ;;  %vm1270_vm5 = vcmask 1043456   ;;  %v2457_v13 = vld [vmem:[%s2755_s20 + $0x8] sm:$0xff]  }
 0x172   : > { %2314 = vmatpush3.bf16.msra.mxu0 %v2455_v17  ;;  %2317 = vmatprep.mubr.msk.bf16.mxu0 %vm2532_vm1, %v2531_v18  ;;  %s2535_s23 = smov 80   ;;  %s3088_s8 = sld [smem:[#allocation12_spill]]  ;;  %v1127_v37 = vshrl.u32 %v1126_v34, 7  ;;  %v2458_v14 = vld [vmem:[%s2755_s20] sm:$0xff]   ;;  %vm1431_vm6 = vcmask 261248   ;;  %vm1648_vm7 = vcmask 523264  }
 0x173   : > { %2315 = vmatprep.subr.bf16.mxu0 %v2531_v18  ;;  %2323 = vmatprep.mubr.msk.bf16.mxu1 %vm2532_vm1, %v2531_v18  ;;  %s2536_s24 = smov 64   ;;  %s2537_s0 = smov 48  }
 0x174   : > { %v1128_v39 = vsub.s32 0, %v1127_v37  ;;  %s2538_s27 = smov 16   ;;  %s3090_s9 = sld [smem:[#allocation21_spill]] }
 0x175   : > { %s3096_s2 = sld [smem:[#allocation5_spill]] }
 0x176   : > { %v2820_v20 = vld [vmem:[#allocation2] sm:$0xff]  ;;  %2316 = vmatpush3.bf16.msra.mxu0 %v2456_v19  ;;  %s3087_s6 = scalar_lea.vmem %s3086_s3, %s2720_s10 }
 0x177   : > { %v1131_v21 = vpack.c.bf16 %v2820_v20, %v2820_v20  ;;  %2327 = vmatprep.subr.bf16.mxu0 %v2531_v18  ;;  %v2237_v22 = vld [vmem:[%s3087_s6] ss:$0 sm:$0xff] }
 0x178   : > { %s3089_s13 = scalar_lea.vmem %s3088_s8, %s3124_s30 }
 0x179   : > { %2318 = vmatmul.mubr.msk.bf16.vlgmr.msra.gmra.mxu0 %vm1155_vm2, %v1131_v21  ;;  %v1122_v35 = vld [vmem:[%s3089_s13] sm:$0x1]  ;;  %s3095_s13 = scalar_lea.vmem %s3022_s14, %s2720_s10 }
 0x17a   : > { %2329 = vmatprep.mubr.msk.bf16.mxu0 %vm2532_vm1, %v2531_v18  ;;  %v1123_v36 = vsub.f32 1.0, %v1122_v35  ;;  %s3091_s11 = scalar_lea.vmem %s3090_s9, %s2720_s10 }
 0x17b   : > { %p2263_p8 = scmp.ne.s32.totalorder %s3096_s2, 1 }
 0x17c   : > { %v1124_v38 = vmul.f32 -1e+09, %v1123_v36  ;;  %s3097_s3 = sld [smem:[#allocation24_spill]] (!%p2263_p8) }
 0x17d   : > { %s3099_s21 = sld [smem:[#allocation13_spill]] (!%p2263_p8) }
 0x17e   : > { %v1129_v40 = vrot.slane %v1124_v38, %v1128_v39  ;;  %s3103_s9 = sld [smem:[#allocation29_spill]] (!%p2263_p8) }
 0x17f   : > { %s3107_s8 = sld [smem:[#allocation14_spill]] (!%p2263_p8) }
 0x239   : > { %v1193_v23 = vpop.f32.mrf.mxu0 }
 0x23a   : > { %v1194_v24 = vadd.f32 %v2237_v22, %v1193_v23 }
 0x23b   : > { %v2319_v25 = vpop.f32.mrf.mxu0 }
 0x23c   : > { %v2836_v26 = vpack.c.bf16 %v1194_v24, %v1194_v24 }
 0x23d   : > { %v1196_v27 = vpop.f32.mrf.mxu0 }
 0x23e   : > { %1315 = vrot.lane.b32.xlu1 %v2836_v26, %s2533_s5  ;;  %1201 = vrot.lane.b32.xlu0 %v2836_v26, %s2534_s28  ;;  %s3092_s5 = sld [smem:[#allocation22_spill]] }
 0x23f   : > { %v2320_v28 = vpop.f32.mrf.mxu0 }
 0x240   : > { %v2245_v28 = vld [vmem:[%s3091_s11] ss:$0 sm:$0xff]  ;;  %s3104_s11 = smov (!%p2263_p8), %s3103_s9 }
 0x242   : > { %1317 = vrot.lane.b32.xlu0 %v2836_v26, %s2535_s23 }
 0x244   : > { %s3093_s28 = scalar_lea.vmem %s3092_s5, %s2720_s10  ;;  %s3098_s5 = sld [smem:[#allocation27_spill]] (!%p2263_p8) }
 0x2b0   : > { %v1202_v29 = vpop.permute.xlu0 %1201  ;;  %v1316_v33 = vpop.permute.xlu1 %1315 }
 0x2b1   : > { %v1208_v30 = vsel %vm1203_vm3, %v1202_v29, 0 }
 0x2b2   : > { %2322 = vmatpush3.bf16.xpose.msra.mxu1 %v1208_v30 }
 0x2b3   : > { %2333 = vmatprep.subr.bf16.mxu1 %v2531_v18 }
 0x2b4   : > { %v1318_v31 = vpop.permute.xlu0 %1317 }
 0x2b5   : > { %v1323_v32 = vsel %vm1203_vm3, %v1318_v31, 0 }
 0x2b9   : > { %2324 = vmatmul.mubr.msk.bf16.vlgmr.msra.gmra.mxu1 %vm1203_vm3, %v2836_v26 }
 0x2ba   : > { %2334 = vmatpush3.bf16.xpose.msra.mxu1 %v1323_v32  ;;  %2335 = vmatprep.mubr.msk.bf16.mxu1 %vm2532_vm1, %v2531_v18 }
 0x2bb   : > { %2345 = vmatprep.subr.bf16.mxu1 %v2531_v18 }
 0x2c1   : > { %2336 = vmatmul.mubr.msk.bf16.vlgmr.msra.gmra.mxu1 %vm1203_vm3, %v1316_v33 }
 0x2c2   : > { %2349 = vmatprep.mubr.msk.bf16.mxu1 %vm2532_vm1, %v2531_v18  ;;  %2346 = vmatpush3.bf16.msra.mxu1 %v2457_v13 }
 0x2c3   : > { %2347 = vmatprep.subr.bf16.mxu1 %v2531_v18 }
 0x2c6   : > { %2348 = vmatpush3.bf16.msra.mxu1 %v2458_v14 }
 0x2c7   : > { %2361 = vmatprep.subr.bf16.mxu1 %v2531_v18 }
 0x379   : > { %v1244_v41 = vpop.f32.mrf.mxu1 }
 0x37a   : > { %v1250_v42 = vmul.f32 0.25, %v1244_v41  ;;  %v2459_v41 = vld [vmem:[%s2772_s25 + $0x8] sm:$0xff]  }
 0x37b   : > { %v2325_v43 = vpop.f32.mrf.mxu1 }
 0x37c   : > { %v1251_v44 = vadd.f32 %v1250_v42, %v1129_v40  ;;  %v2460_v42 = vld [vmem:[%s2772_s25] sm:$0xff]   ;;  %s3094_s25 = scalar_lea.vmem %s3020_s12, %s2720_s10 }
 0x37d   : > { %v1247_v45 = vpop.f32.mrf.mxu1 }
 0x37e   : > { %v1253_v46 = vsel %vm1252_vm4, %v1251_v44, -inf }
 0x37f   : > { %1254 = vmax.xlane.f32.xlu1 %v1253_v46  ;;  %v2326_v47 = vpop.f32.mrf.mxu1  ;;  %v2249_v46 = vld [vmem:[%s3093_s28] ss:$0 sm:$0xff] }
 0x381   : > { %v1359_v48 = vpop.f32.mrf.mxu1 }
 0x382   : > { %v1365_v49 = vmul.f32 0.25, %v1359_v48  ;;  %v2250_v48 = vld [vmem:[%s3094_s25] ss:$0 sm:$0xff]  ;;  %s3100_s25 = scalar_lea.vmem (!%p2263_p8), %s3099_s21, %s3124_s30 }
 0x383   : > { %v2337_v50 = vpop.f32.mrf.mxu1 }
 0x384   : > { %v1366_v51 = vadd.f32 %v1365_v49, %v1129_v40 }
 0x385   : > { %v1362_v52 = vpop.f32.mrf.mxu1 }
 0x386   : > { %v1367_v53 = vsel %vm1252_vm4, %v1366_v51, -inf  ;;  %v2461_v52 = vld [vmem:[%s2782_s22 + $0x18] sm:$0xff]  }
 0x387   : > { %1368 = vmax.xlane.f32.xlu0 %v1367_v53  ;;  %v2338_v54 = vpop.f32.mrf.mxu1  ;;  %v2462_v53 = vld [vmem:[%s2782_s22 + $0x10] sm:$0xff]  }
 0x388   : > { %v2463_v54 = vld [vmem:[%s2782_s22 + $0x8] sm:$0xff]  }
 0x408   : > { %v1255_v55 = vpop.xlane.xlu1 %1254 }
 0x409   : > { %v1256_v56 = vsub.f32 %v1251_v44, %v1255_v55  ;;  %v2464_v55 = vld [vmem:[%s2782_s22] sm:$0xff]   ;;  %s3108_s22 = scalar_lea.vmem (!%p2263_p8), %s3107_s8, %s3124_s30 }
 0x40b   : > { %v1257_v57 = vmul.f32 1.442695, %v1256_v56  ;;  %v2251_v56 = vld [vmem:[%s3095_s13] ss:$0 sm:$0xff]  ;;  %s3101_s13 = sld [smem:[#allocation26_spill]] (!%p2263_p8) }
 0x40d   : > { %2465 = vpow2.f32 %v1257_v57 }
 0x410   : > { %v1369_v58 = vpop.xlane.xlu0 %1368 }
 0x411   : > { %v1370_v59 = vsub.f32 %v1366_v51, %v1369_v58 }
 0x413   : > { %v1371_v60 = vmul.f32 1.442695, %v1370_v59 }
 0x415   : > { %2467 = vpow2.f32 %v1371_v60 }
 0x41a   : > { %v2466_v61 = vpop.eup %2465 }
 0x41b   : > { %v1259_v62 = vsel %vm1252_vm4, %v2466_v61, 0.0 }
 0x41c   : > { %1260 = vadd.xlane.f32.xlu0 %v1259_v62 }
 0x422   : > { %v2468_v63 = vpop.eup %2467 }
 0x423   : > { %v1373_v0 = vsel %vm1252_vm4, %v2468_v63, 0.0 }
 0x424   : > { %1374 = vadd.xlane.f32.xlu1 %v1373_v0 }
 0x432   : > { %1265 = vrot.lane.b32.xlu0 %v2836_v26, %s2536_s24 }
 0x435   : > { %1379 = vrot.lane.b32.xlu1 %v2836_v26, %s2537_s0 }
 0x4a5   : > { %v1261_v1 = vpop.xlane.xlu0 %1260 }
 0x4a6   : > { %2469 = vrcp.f32 %v1261_v1 }
 0x4a9   : > { %v1266_v2 = vpop.permute.xlu0 %1265 }
 0x4aa   : > { %v1272_v3 = vsel %vm1270_vm5, %v1266_v2, 0 }
 0x4ab   : > { %2328 = vmatpush3.bf16.msra.mxu0 %v1272_v3 }
 0x4ac   : > { %2339 = vmatprep.subr.bf16.mxu0 %v2531_v18 }
 0x4ad   : > { %v1375_v4 = vpop.xlane.xlu1 %1374 }
 0x4ae   : > { %2471 = vrcp.f32 %v1375_v4 }
 0x4b1   : > { %v1380_v7 = vpop.permute.xlu1 %1379 }
 0x4b2   : > { %v1385_v9 = vsel %vm1270_vm5, %v1380_v7, 0  ;;  %v2255_v7 = vld [vmem:[%s1070_s1] ss:$0 sm:$0xff]  ;;  %s3109_s1 = sld [smem:[#allocation15_spill]] (!%p2263_p8) }
 0x4b3   : > { %v2470_v5 = vpop.eup %2469 }
 0x4b4   : > { %v1263_v6 = vmul.f32 %v2470_v5, %v2466_v61 }
 0x4b6   : > { %v1264_v8 = vpack.c.bf16 %v1263_v6, %v1263_v6 }
 0x4b8   : > { %2330 = vmatmul.mubr.msk.bf16.vlgmr.msra.gmra.mxu0 %vm1252_vm4, %v1264_v8  ;;  %s3110_s0 = scalar_lea.vmem (!%p2263_p8), %s3109_s1, %s3124_s30 }
 0x4b9   : > { %2340 = vmatpush3.bf16.msra.mxu0 %v1385_v9  ;;  %2341 = vmatprep.mubr.msk.bf16.mxu0 %vm2532_vm1, %v2531_v18 }
 0x4ba   : > { %2353 = vmatprep.subr.bf16.mxu0 %v2531_v18 }
 0x4bb   : > { %v2472_v10 = vpop.eup %2471 }
 0x4bc   : > { %v1377_v11 = vmul.f32 %v2472_v10, %v2468_v63 }
 0x4be   : > { %v1378_v12 = vpack.c.bf16 %v1377_v11, %v1377_v11 }
 0x4c0   : > { %2342 = vmatmul.mubr.msk.bf16.vlgmr.msra.gmra.mxu0 %vm1252_vm4, %v1378_v12 }
 0x4c1   : > { %2357 = vmatprep.mubr.msk.bf16.mxu0 %vm2532_vm1, %v2531_v18  ;;  %2354 = vmatpush3.bf16.msra.mxu0 %v2459_v41 }
 0x4c2   : > { %2355 = vmatprep.subr.bf16.mxu0 %v2531_v18 }
 0x4c5   : > { %2356 = vmatpush3.bf16.msra.mxu0 %v2460_v42 }
 0x578   : > { %v1308_v15 = vpop.f32.mrf.mxu0 }
 0x579   : > { %1314 = vst.msk [vmem:[#allocation3] sm:$0xff] %vm1203_vm3, %v1308_v15 }
 0x57a   : > { %v2331_v16 = vpop.f32.mrf.mxu0 }
 0x57c   : > { %v1311_v17 = vpop.f32.mrf.mxu0 }
 0x57e   : > { %v2332_v19 = vpop.f32.mrf.mxu0 }
 0x580   : > { %v1421_v21 = vpop.f32.mrf.mxu0 }
 0x581   : > { %1428 = vrot.lane.b32.xlu1 %v1421_v21, %s2538_s27  ;;  %s3102_s27 = sld [smem:[#allocation25_spill]] (!%p2263_p8) }
 0x582   : > { %v2343_v22 = vpop.f32.mrf.mxu0 }
 0x584   : > { %v1424_v23 = vpop.f32.mrf.mxu0 }
 0x586   : > { %v2344_v24 = vpop.f32.mrf.mxu0 }
 0x5f3   : > { %v1429_v25 = vpop.permute.xlu1 %1428 }
 0x5f4   : > { %1432 = vst.msk [vmem:[#allocation3] sm:$0xff] %vm1431_vm6, %v1429_v25 }
 0x5fb   : > { %v1433_v26 = vld [vmem:[#allocation3] sm:$0xff] }
 0x5fc   : > { %v1434_v27 = vpack.c.bf16 %v1433_v26, %v1433_v26  ;;  %v2261_v26 = vld [vmem:[%s1073_s4] ss:$0 sm:$0xff] }
 0x5fe   : > { %2350 = vmatmul.mubr.msk.bf16.vlgmr.msra.gmra.mxu1 %vm1155_vm2, %v1434_v27 }
 0x5ff   : > { %2369 = vmatprep.mubr.msk.bf16.mxu1 %vm2532_vm1, %v2531_v18  ;;  %2362 = vmatpush3.bf16.msra.mxu1 %v2461_v52 }
 0x600   : > { %2363 = vmatprep.subr.bf16.mxu1 %v2531_v18 }
 0x603   : > { %2364 = vmatpush3.bf16.msra.mxu1 %v2462_v53 }
 0x604   : > { %2365 = vmatprep.subr.bf16.mxu1 %v2531_v18 }
 0x607   : > { %2366 = vmatpush3.bf16.msra.mxu1 %v2463_v54 }
 0x608   : > { %2367 = vmatprep.subr.bf16.mxu1 %v2531_v18 }
 0x60b   : > { %2368 = vmatpush3.bf16.msra.mxu1 %v2464_v55 }
 0x6be   : > { %v1495_v29 = vpop.f32.mrf.mxu1 }
 0x6bf   : > { %v1496_v30 = vadd.f32 %v2245_v28, %v1495_v29  ;;  %v2262_v28 = vld [vmem:[%s1076_s29] ss:$0 sm:$0xff] }
 0x6c0   : > { %v2351_v31 = vpop.f32.mrf.mxu1 }
 0x6c1   : > { %v1501_v32 = vadd.f32 %v1496_v30, %v2820_v20 }
 0x6c2   : > { %v1498_v33 = vpop.f32.mrf.mxu1 }
 0x6c3   : > { %v1504_v34 = vsel %vm1155_vm2, %v1501_v32, 0.0 }
 0x6c4   : > { %1505 = vadd.xlane.f32.xlu0 %v1504_v34  ;;  %v2352_v35 = vpop.f32.mrf.mxu1 }
 0x74d   : > { %v1506_v36 = vpop.xlane.xlu0 %1505 }
 0x74e   : > { %v1508_v37 = vmul.f32 0.03125, %v1506_v36 }
 0x750   : > { %v1509_v38 = vsub.f32 %v1501_v32, %v1508_v37 }
 0x752   : > { %v1510_v39 = vmul.f32 %v1509_v38, %v1509_v38 }
 0x754   : > { %v1511_v40 = vsel %vm1155_vm2, %v1510_v39, 0.0 }
 0x755   : > { %1512 = vadd.xlane.f32.xlu1 %v1511_v40 }
 0x7de   : > { %v1513_v20 = vpop.xlane.xlu1 %1512 }
 0x7df   : > { %v1514_v43 = vmul.f32 0.03125, %v1513_v20 }
 0x7e1   : > { %v1515_v44 = vadd.f32 1e-12, %v1514_v43 }
 0x7e3   : > { %2473 = vrsqrt.f32 %v1515_v44 }
 0x7f0   : > { %v2474_v45 = vpop.eup %2473 }
 0x7f1   : > { %v1517_v47 = vmul.f32 %v2474_v45, %v1509_v38 }
 0x7f3   : > { %v1524_v49 = vmul.f32 %v2249_v46, %v1517_v47 }
 0x7f5   : > { %v1531_v50 = vadd.f32 %v2250_v48, %v1524_v49 }
 0x7f7   : > { %v1532_v51 = vpack.c.bf16 %v1531_v50, %v1531_v50 }
 0x7f9   : > { %2358 = vmatmul.mubr.msk.bf16.vlgmr.msra.gmra.mxu0 %vm1155_vm2, %v1532_v51 }
 0x8b9   : > { %v1593_v57 = vpop.f32.mrf.mxu0 }
 0x8ba   : > { %v1594_v58 = vadd.f32 %v2251_v56, %v1593_v57 }
 0x8bb   : > { %v2359_v59 = vpop.f32.mrf.mxu0 }
 0x8bc   : > { %v1600_v60 = vmul.f32 0.044715, %v1594_v58  ;;  %v1599_v18 = vmul.f32 0.5, %v1594_v58 }
 0x8bd   : > { %v1596_v61 = vpop.f32.mrf.mxu0 }
 0x8be   : > { %v1601_v62 = vmul.f32 %v1600_v60, %v1594_v58 }
 0x8bf   : > { %v2360_v63 = vpop.f32.mrf.mxu0 }
 0x8c0   : > { %v1602_v0 = vmul.f32 %v1601_v62, %v1594_v58 }
 0x8c2   : > { %v1603_v1 = vadd.f32 %v1602_v0, %v1594_v58 }
 0x8c4   : > { %v1604_v2 = vmul.f32 0.7978846, %v1603_v1 }
 0x8c6   : > { %2475 = vtanh.f32 %v1604_v2 }
 0x8d3   : > { %v2476_v3 = vpop.eup %2475 }
 0x8d4   : > { %v1606_v4 = vadd.f32 1.0, %v2476_v3 }
 0x8d6   : > { %v1607_v5 = vmul.f32 %v1606_v4, %v1599_v18 }
 0x8d8   : > { %v1608_v6 = vpack.c.bf16 %v1607_v5, %v1607_v5 }
 0x8da   : > { %2370 = vmatmul.mubr.msk.bf16.vlgmr.msra.gmra.mxu1 %vm1648_vm7, %v1608_v6 }
 0x99a   : > { %v1686_v8 = vpop.f32.mrf.mxu1 }
 0x99b   : > { %v1687_v9 = vadd.f32 %v2255_v7, %v1686_v8 }
 0x99c   : > { %v2371_v10 = vpop.f32.mrf.mxu1 }
 0x99d   : > { %v1692_v11 = vadd.f32 %v1687_v9, %v1531_v50 }
 0x99e   : > { %v1689_v12 = vpop.f32.mrf.mxu1 }
 0x99f   : > { %v1695_v13 = vsel %vm1155_vm2, %v1692_v11, 0.0 }
 0x9a0   : > { %1696 = vadd.xlane.f32.xlu0 %v1695_v13  ;;  %v2372_v14 = vpop.f32.mrf.mxu1 }
 0xa29   : > { %v1697_v15 = vpop.xlane.xlu0 %1696 }
 0xa2a   : > { %v1698_v16 = vmul.f32 0.03125, %v1697_v15 }
 0xa2c   : > { %v1699_v17 = vsub.f32 %v1692_v11, %v1698_v16 }
 0xa2e   : > { %v1700_v19 = vmul.f32 %v1699_v17, %v1699_v17 }
 0xa30   : > { %v1701_v21 = vsel %vm1155_vm2, %v1700_v19, 0.0 }
 0xa31   : > { %1702 = vadd.xlane.f32.xlu0 %v1701_v21 }
 0xaba   : > { %v1703_v22 = vpop.xlane.xlu0 %1702 }
 0xabb   : > { %v1704_v23 = vmul.f32 0.03125, %v1703_v22 }
 0xabd   : > { %v1705_v24 = vadd.f32 1e-12, %v1704_v23 }
 0xabf   : > { %2477 = vrsqrt.f32 %v1705_v24 }
 0xacc   : > { %v2478_v25 = vpop.eup %2477 }
 0xacd   : > { %v1707_v27 = vmul.f32 %v2478_v25, %v1699_v17 }
 0xacf   : > { %v1714_v29 = vmul.f32 %v2261_v26, %v1707_v27  ;;  %1726 = sbr.rel (%p2263_p8) target bundleno = 3431 (0xd67), region = 132 }
 0xad1   : > { %v1721_v30 = vadd.f32 %v2262_v28, %v1714_v29 }
 0xad3   : > { %1722 = vst.msk [vmem:[#allocation2] sm:$0xff] %vm1155_vm2, %v1721_v30 }
 0xad4   : > { %v2479_v31 = vld [vmem:[%s3097_s3 + $0x8] sm:$0xff]   ;;  %v2539_v32 = vmov 0.0   ;;  %v2480_v33 = vld [vmem:[%s3097_s3] sm:$0xff]   ;;  %vm2540_vm8 = vmmov 0   ;;  %v1727_v34 = vpack.c.bf16 %v1721_v30, %v1721_v30  ;;  %vm1801_vm9 = vcmask 1041408  }
 0xad5   : > { %2373 = vmatprep.subr.bf16.mxu0 %v2539_v32  ;;  %2381 = vmatprep.subr.bf16.mxu1 %v2539_v32  ;;  %v1796_v35 = vld [vmem:[%s3098_s5] sm:$0x3]  ;;  %vm1797_vm10 = vcmask 31744   ;;  %v2481_v39 = vld [vmem:[%s3101_s13 + $0x8] sm:$0xff]   ;;  %s3105_s5 = sld [smem:[#allocation28_spill]]  ;;  %vm1964_vm11 = vcmask 0  }
 0xad6   : > { %2374 = vmatpush3.bf16.msra.mxu0 %v2479_v31  ;;  %2377 = vmatprep.mubr.msk.bf16.mxu0 %vm2540_vm8, %v2539_v32  ;;  %v1803_v36 = vsel %vm1801_vm9, %v1796_v35, 0  ;;  %v1789_v37 = vld [vmem:[%s3100_s25] sm:$0x1]  ;;  %v2483_v52 = vld [vmem:[%s3103_s9 + $0x8] sm:$0xff]   ;;  %v1908_v63 = vld [vmem:[#allocation4] sm:$0x1] }
 0xad7   : > { %2375 = vmatprep.subr.bf16.mxu0 %v2539_v32  ;;  %2383 = vmatprep.mubr.msk.bf16.mxu1 %vm2540_vm8, %v2539_v32  ;;  %v1795_v38 = vpack.c.bf16 %v1789_v37, %v1789_v37  ;;  %v2482_v40 = vld [vmem:[%s3101_s13] sm:$0xff]  }
 0xad8   : > { %2382 = vmatpush3.bf16.msra.mxu1 %v1803_v36  ;;  %v1732_v41 = vld [vmem:[%s3102_s27] sm:$0x1] }
 0xad9   : > { %2387 = vmatprep.subr.bf16.mxu1 %v2539_v32  ;;  %v2484_v53 = vld [vmem:[%s3104_s11] sm:$0xff]  }
 0xada   : > { %2376 = vmatpush3.bf16.msra.mxu0 %v2480_v33  ;;  %v1966_v9 = vld [vmem:[%s3108_s22] sm:$0x1] }
 0xadb   : > { %2395 = vmatprep.subr.bf16.mxu0 %v2539_v32  ;;  %2384 = vmatmul.mubr.msk.bf16.vlgmr.msra.gmra.mxu1 %vm1797_vm10, %v1795_v38  ;;  %v1900_v55 = vld [vmem:[%s3105_s5] sm:$0x1] }
 0xadc   : > { %2391 = vmatprep.mubr.msk.bf16.mxu1 %vm2540_vm8, %v2539_v32  ;;  %2388 = vmatpush3.bf16.msra.mxu1 %v2481_v39  ;;  %v1967_v15 = vld [vmem:[%s3110_s0] sm:$0x1] }
 0xadd   : > { %2378 = vmatmul.mubr.msk.bf16.vlgmr.msra.gmra.mxu0 %vm1155_vm2, %v1727_v34  ;;  %2389 = vmatprep.subr.bf16.mxu1 %v2539_v32 }
 0xade   : > { %2399 = vmatprep.mubr.msk.bf16.mxu0 %vm2540_vm8, %v2539_v32  ;;  %2396 = vmatpush3.bf16.msra.mxu0 %v2483_v52 }
 0xadf   : > { %2397 = vmatprep.subr.bf16.mxu0 %v2539_v32 }
 0xae0   : > { %2390 = vmatpush3.bf16.msra.mxu1 %v2482_v40 }
 0xae2   : > { %2398 = vmatpush3.bf16.msra.mxu0 %v2484_v53 }
 0xb9b   : > { %v1839_v48 = vpop.f32.mrf.mxu1 }
 0xb9d   : > { %v1782_v42 = vpop.f32.mrf.mxu0  ;;  %v2385_v49 = vpop.f32.mrf.mxu1 }
 0xb9e   : > { %v1783_v20 = vadd.f32 %v1782_v42, %v1732_v41 }
 0xb9f   : > { %v2379_v43 = vpop.f32.mrf.mxu0  ;;  %v1842_v50 = vpop.f32.mrf.mxu1 }
 0xba0   : > { %2485 = vtanh.f32 %v1783_v20 }
 0xba1   : > { %v1785_v44 = vpop.f32.mrf.mxu0  ;;  %v2386_v51 = vpop.f32.mrf.mxu1 }
 0xba3   : > { %v2380_v45 = vpop.f32.mrf.mxu0 }
 0xbad   : > { %v2486_v46 = vpop.eup %2485 }
 0xbae   : > { %v1790_v47 = vpack.c.bf16 %v2486_v46, %v2486_v46 }
 0xbb0   : > { %2392 = vmatmul.mubr.msk.bf16.vlgmr.msra.gmra.mxu1 %vm1155_vm2, %v1790_v47 }
 0xc70   : > { %v1894_v54 = vpop.f32.mrf.mxu1 }
 0xc71   : > { %v1895_v56 = vadd.f32 %v1894_v54, %v1839_v48 }
 0xc72   : > { %v2393_v57 = vpop.f32.mrf.mxu1 }
 0xc73   : > { %v1901_v58 = vadd.f32 %v1900_v55, %v1895_v56 }
 0xc74   : > { %v1897_v59 = vpop.f32.mrf.mxu1 }
 0xc75   : > { %v1902_v60 = vmax.f32 %v1901_v58, 0.0 }
 0xc76   : > { %v2394_v61 = vpop.f32.mrf.mxu1 }
 0xc77   : > { %v1903_v62 = vpack.c.bf16 %v1902_v60, %v1902_v60 }
 0xc79   : > { %2400 = vmatmul.mubr.msk.bf16.vlgmr.msra.gmra.mxu0 %vm1155_vm2, %v1903_v62 }
 0xd39   : > { %v1958_v0 = vpop.f32.mrf.mxu0 }
 0xd3a   : > { %v1959_v1 = vadd.f32 %v1958_v0, %v1908_v63 }
 0xd3b   : > { %v2401_v2 = vpop.f32.mrf.mxu0 }
 0xd3c   : > { %1965 = vst.msk [vmem:[%s1079_s26] sm:$0x1] %vm1964_vm11, %v1959_v1  ;;  %v1971_v3 = vand.u32 2147483647, %v1959_v1  ;;  %v1968_v10 = vmax.f32 %v1959_v1, 0.0  ;;  %v1969_v11 = vmul.f32 %v1966_v9, %v1959_v1 }
 0xd3d   : > { %v1961_v18 = vpop.f32.mrf.mxu0 }
 0xd3e   : > { %v1972_v4 = vsub.f32 0.0, %v1971_v3  ;;  %v1970_v13 = vsub.f32 %v1968_v10, %v1969_v11 }
 0xd3f   : > { %v2402_v5 = vpop.f32.mrf.mxu0 }
 0xd40   : > { %v1973_v6 = vmul.f32 1.442695, %v1972_v4 }
 0xd42   : > { %2487 = vpow2.f32 %v1973_v6 }
 0xd4f   : > { %v2488_v7 = vpop.eup %2487 }
 0xd50   : > { %v1975_v8 = vadd.f32 1.0, %v2488_v7 }
 0xd52   : > { %2489 = vlog2.f32 %v1975_v8 }
 0xd5f   : > { %v2490_v12 = vpop.eup %2489 }
 0xd60   : > { %v1977_v14 = vmul.f32 0.6931472, %v2490_v12 }
 0xd62   : > { %v1978_v16 = vadd.f32 %v1977_v14, %v1970_v13 }
 0xd64   : > { %v1979_v17 = vmul.f32 %v1978_v16, %v1967_v15 }
 0xd66   : > { %1980 = vst.msk [vmem:[%s1082_s19] sm:$0x1] %vm1964_vm11, %v1979_v17 }
 0xd67 PF: > { %s3112_s9 = sld [smem:[#allocation8_spill]] }
 0xd68   : > { %s3113_s8 = sld [smem:[#allocation6_spill]] }
 0xd69   : > { %s3114_s30 = sld [smem:[#allocation7_spill]] }
 0xd6a   : > { %s3116_s5 = sld [smem:[#allocation10_spill]] }
 0xd6d   : > { %s40_s28 = sadd.s32 1, %s3112_s9   ;;  %s3115_s9 = sld [smem:[#allocation9_spill]] }
 0xd6e   : > { %p37_p9 = scmp.ge.s32.totalorder %s40_s28, 6  }
 0xd70   :  { %39 = sbr.rel (!%p37_p9) target bundleno = 22 (0x16), region = 222 }

</bundles_post_ra>
